<compile_context>
chip_gen: v5e
topology: v5e:2x2
jax: 0.10.0
libtpu: 0.0.40
codegen_flags: <defaults>
</compile_context>

<pallas_src>
import functools

import jax
import jax.numpy as jnp
from jax.experimental import pallas as pl
from jax.experimental.pallas import tpu as pltpu


def _round_up(x, m):
    return ((x + m - 1) // m) * m


def _pick_oc_tile(total, cap=512):
    # total is a multiple of 128; pick the largest 128-multiple tile <= cap dividing it.
    if total <= cap:
        return total
    for t in (512, 384, 256, 128):
        if t <= cap and total % t == 0:
            return t
    return 128


def _shifted_conv_bias_relu_kernel(x_ref, w_ref, b_ref, o_ref, *, taps, m_rows):
    """One (batch image, O-tile) grid step.

    x_ref: (1, Lp, C)      f32   flattened zero-padded image (+ small tail padding)
    w_ref: (T, C, to)      bf16  per-tap weight slabs, T = kh*kw
    b_ref: (1, to)         f32
    o_ref: (1, m_rows, to) f32   'wide' flattened output rows (bias + ReLU applied)
    """
    acc = jnp.zeros((m_rows, o_ref.shape[2]), jnp.float32)
    for t, shift in enumerate(taps):                      # static unroll over kh*kw taps
        xs = x_ref[0, pl.ds(shift, m_rows), :]            # (m_rows, C) shifted view
        acc += jnp.dot(xs.astype(jnp.bfloat16), w_ref[t],
                       preferred_element_type=jnp.float32)
    acc += b_ref[...]                                     # bias broadcast over rows (f32)
    o_ref[0] = jnp.maximum(acc, 0.0)                      # ReLU


def conv2d_block_forward_nhwc(x_nhwc, weight, bias, *, stride=1, padding=0, oc_cap=512):
    """x_nhwc: (N, H, W, C) f32; weight: (O, C, kh, kw) [PyTorch OIHW]; bias: (O,).
    Returns (N, H_out, W_out, O) = relu(conv2d(zero_pad(x)) + bias)."""
    N, H, W, C = x_nhwc.shape
    O, Cw, kh, kw = weight.shape
    assert C == Cw

    # --- thin glue (XLA): zero pad + flatten spatial dims (channel axis stays last) ---
    xp = jnp.pad(x_nhwc, ((0, 0), (padding, padding), (padding, padding), (0, 0)))
    Hp, Wp = H + 2 * padding, W + 2 * padding
    # stride-1 "wide" output grid (computed in-kernel), real strided output derived below
    H_full = Hp - kh + 1
    W_full = Wp - kw + 1
    H_out = (Hp - kh) // stride + 1
    W_out = (Wp - kw) // stride + 1

    M_wide = (H_full - 1) * Wp + W_full          # valid flat length of the wide output
    Mp = _round_up(M_wide, 8)                    # sublane-aligned row count per image
    max_shift = (kh - 1) * Wp + (kw - 1)
    Lp = max(Hp * Wp, _round_up(Mp + max_shift, 8))

    x_flat = xp.reshape(N, Hp * Wp, C).astype(jnp.float32)
    x_flat = jnp.pad(x_flat, ((0, 0), (0, Lp - Hp * Wp), (0, 0)))

    # weights: OIHW -> (kh, kw, C, O) -> (kh*kw, C, Op); bias -> (1, Op)
    Op = _round_up(O, 128)                       # lane-dense output (unmasked stores)
    w_taps = weight.transpose(2, 3, 1, 0).reshape(kh * kw, C, O).astype(jnp.bfloat16)
    w_taps = jnp.pad(w_taps, ((0, 0), (0, 0), (0, Op - O)))
    b_flat = jnp.pad(bias.reshape(1, O).astype(jnp.float32), ((0, 0), (0, Op - O)))

    to = _pick_oc_tile(Op, oc_cap)
    taps = tuple(i * Wp + j for i in range(kh) for j in range(kw))
    kernel = functools.partial(_shifted_conv_bias_relu_kernel, taps=taps, m_rows=Mp)

    # --- hot path: fused shifted-matmul conv + bias + ReLU in Pallas ---
    out_flat = pl.pallas_call(
        kernel,
        out_shape=jax.ShapeDtypeStruct((N, Mp, Op), jnp.float32),
        grid_spec=pltpu.PrefetchScalarGridSpec(
            num_scalar_prefetch=0,
            grid=(N, Op // to),
            in_specs=[
                pl.BlockSpec((1, Lp, C), lambda n, oc: (n, 0, 0)),        # image slab
                pl.BlockSpec((kh * kw, C, to), lambda n, oc: (0, 0, oc)), # tap weights
                pl.BlockSpec((1, to), lambda n, oc: (0, oc)),             # bias
            ],
            out_specs=pl.BlockSpec((1, Mp, to), lambda n, oc: (n, 0, oc)),
        ),
        compiler_params=pltpu.CompilerParams(
            dimension_semantics=("parallel", "parallel")),
    )(x_flat, w_taps, b_flat)

    # --- unpack the wide output: drop wrap columns, subsample for stride ---
    y = out_flat[:, :M_wide, :O]
    y = jnp.pad(y, ((0, 0), (0, H_full * Wp - M_wide), (0, 0)))
    y = y.reshape(N, H_full, Wp, O)[:, :, :W_full, :]
    if stride > 1:
        y = y[:, ::stride, ::stride, :]
    assert y.shape == (N, H_out, W_out, O)
    return y


def conv2d_block_forward(x, weight, bias, *, stride=1, padding=0):
    """PyTorch-layout boundary wrapper: x (N, C, H, W) -> (N, O, H_out, W_out).
    For chained layers, call conv2d_block_forward_nhwc directly and transpose only at
    the model boundary (avoids a full HBM pass per layer)."""
    x_nhwc = jnp.transpose(x, (0, 2, 3, 1))
    y_nhwc = conv2d_block_forward_nhwc(x_nhwc, weight, bias,
                                       stride=stride, padding=padding)
    return jnp.transpose(y_nhwc, (0, 3, 1, 2))


if __name__ == "__main__":
    # Conv2dBlock(input_dim=4, output_dim=8, kernel_size=3, stride=1, padding=1,
    #             norm='none', activation='relu', pad_type='zero')
    N, C, H, W = 2, 4, 16, 16
    O, kh, kw = 8, 3, 3
    stride, padding = 1, 1

    key = jax.random.PRNGKey(0)
    kx, kw_, kb = jax.random.split(key, 3)
    x = jax.random.normal(kx, (N, C, H, W), dtype=jnp.float32)
    # deterministic synthetic parameters (module shapes from nn.Conv2d(4, 8, 3, 1, bias=True))
    fan_in = C * kh * kw
    bound = 1.0 / (fan_in ** 0.5)
    weight = jax.random.uniform(kw_, (O, C, kh, kw), jnp.float32, -bound, bound)
    bias = jax.random.uniform(kb, (O,), jnp.float32, -bound, bound)

    y = conv2d_block_forward(x, weight, bias, stride=stride, padding=padding)
    y = jax.block_until_ready(y)

    # sanity check against the pure-JAX f32 reference (same semantics as PyTorch NCHW conv)
    ref = jax.lax.conv_general_dilated(
        x, weight, window_strides=(stride, stride),
        padding=[(padding, padding), (padding, padding)],
        dimension_numbers=("NCHW", "OIHW", "NCHW"))
    ref = jnp.maximum(ref + bias.reshape(1, O, 1, 1), 0.0)
    assert y.shape == (N, O, H, W)
    # bf16 MXU inputs with f32 accumulation -> loosened tolerance vs pure-f32 reference
    assert jnp.allclose(y, ref, atol=5e-2, rtol=5e-2)

    print("KERNEL_OK")
</pallas_src>

<mosaic_0001>
module attributes {stable_mosaic.version = 11 : i64} {
  func.func @_shifted_conv_bias_relu_kernel(%arg0: i32, %arg1: i32, %arg2: memref<1x328x4xf32, #tpu.memory_space<vmem>>, %arg3: memref<9x4x128xbf16, #tpu.memory_space<vmem>>, %arg4: memref<1x128xf32, #tpu.memory_space<vmem>>, %arg5: memref<1x288x128xf32, #tpu.memory_space<vmem>>) attributes {dimension_semantics = [#tpu.dimension_semantics<parallel>, #tpu.dimension_semantics<parallel>], iteration_bounds = array<i64: 2, 1>, scalar_prefetch = 0 : i64, scratch_operands = 0 : i64, tpu.core_type = #tpu.core_type<tc>, window_params = [{transform_indices = @transform_0, window_bounds = array<i64: 1, 328, 4>}, {transform_indices = @transform_1, window_bounds = array<i64: 9, 4, 128>}, {transform_indices = @transform_2, window_bounds = array<i64: 1, 128>}, {transform_indices = @transform_3, window_bounds = array<i64: 1, 288, 128>}]} {
    %cst = arith.constant 0.000000e+00 : f32
    %0 = vector.broadcast %cst : f32 to vector<288x128xf32>
    %c0 = arith.constant 0 : index
    %c0_0 = arith.constant 0 : index
    %c0_1 = arith.constant 0 : index
    %1 = vector.load %arg2[%c0, %c0_0, %c0_1] : memref<1x328x4xf32, #tpu.memory_space<vmem>>, vector<1x288x4xf32>
    %2 = vector.shape_cast %1 : vector<1x288x4xf32> to vector<288x4xf32>
    %3 = arith.truncf %2 : vector<288x4xf32> to vector<288x4xbf16>
    %c0_2 = arith.constant 0 : index
    %c0_3 = arith.constant 0 : index
    %c0_4 = arith.constant 0 : index
    %4 = vector.load %arg3[%c0_2, %c0_3, %c0_4] : memref<9x4x128xbf16, #tpu.memory_space<vmem>>, vector<1x4x128xbf16>
    %5 = vector.shape_cast %4 : vector<1x4x128xbf16> to vector<4x128xbf16>
    %cst_5 = arith.constant dense<0.000000e+00> : vector<288x128xf32>
    %6 = tpu.matmul %3, %5, %cst_5 {dimension_numbers = #tpu.dot_dimension_numbers<[1], [0], [0], [1], [0, 0, 1, 1], [], []>} : vector<288x4xbf16>, vector<4x128xbf16>, vector<288x128xf32> -> vector<288x128xf32>
    %7 = arith.addf %0, %6 : vector<288x128xf32>
    %c0_6 = arith.constant 0 : index
    %c1 = arith.constant 1 : index
    %c0_7 = arith.constant 0 : index
    %8 = vector.load %arg2[%c0_6, %c1, %c0_7] : memref<1x328x4xf32, #tpu.memory_space<vmem>>, vector<1x288x4xf32>
    %9 = vector.shape_cast %8 : vector<1x288x4xf32> to vector<288x4xf32>
    %10 = arith.truncf %9 : vector<288x4xf32> to vector<288x4xbf16>
    %c1_8 = arith.constant 1 : index
    %c0_9 = arith.constant 0 : index
    %c0_10 = arith.constant 0 : index
    %11 = vector.load %arg3[%c1_8, %c0_9, %c0_10] : memref<9x4x128xbf16, #tpu.memory_space<vmem>>, vector<1x4x128xbf16>
    %12 = vector.shape_cast %11 : vector<1x4x128xbf16> to vector<4x128xbf16>
    %cst_11 = arith.constant dense<0.000000e+00> : vector<288x128xf32>
    %13 = tpu.matmul %10, %12, %cst_11 {dimension_numbers = #tpu.dot_dimension_numbers<[1], [0], [0], [1], [0, 0, 1, 1], [], []>} : vector<288x4xbf16>, vector<4x128xbf16>, vector<288x128xf32> -> vector<288x128xf32>
    %14 = arith.addf %7, %13 : vector<288x128xf32>
    %c0_12 = arith.constant 0 : index
    %c2 = arith.constant 2 : index
    %c0_13 = arith.constant 0 : index
    %15 = vector.load %arg2[%c0_12, %c2, %c0_13] : memref<1x328x4xf32, #tpu.memory_space<vmem>>, vector<1x288x4xf32>
    %16 = vector.shape_cast %15 : vector<1x288x4xf32> to vector<288x4xf32>
    %17 = arith.truncf %16 : vector<288x4xf32> to vector<288x4xbf16>
    %c2_14 = arith.constant 2 : index
    %c0_15 = arith.constant 0 : index
    %c0_16 = arith.constant 0 : index
    %18 = vector.load %arg3[%c2_14, %c0_15, %c0_16] : memref<9x4x128xbf16, #tpu.memory_space<vmem>>, vector<1x4x128xbf16>
    %19 = vector.shape_cast %18 : vector<1x4x128xbf16> to vector<4x128xbf16>
    %cst_17 = arith.constant dense<0.000000e+00> : vector<288x128xf32>
    %20 = tpu.matmul %17, %19, %cst_17 {dimension_numbers = #tpu.dot_dimension_numbers<[1], [0], [0], [1], [0, 0, 1, 1], [], []>} : vector<288x4xbf16>, vector<4x128xbf16>, vector<288x128xf32> -> vector<288x128xf32>
    %21 = arith.addf %14, %20 : vector<288x128xf32>
    %c0_18 = arith.constant 0 : index
    %c18 = arith.constant 18 : index
    %c0_19 = arith.constant 0 : index
    %22 = vector.load %arg2[%c0_18, %c18, %c0_19] : memref<1x328x4xf32, #tpu.memory_space<vmem>>, vector<1x288x4xf32>
    %23 = vector.shape_cast %22 : vector<1x288x4xf32> to vector<288x4xf32>
    %24 = arith.truncf %23 : vector<288x4xf32> to vector<288x4xbf16>
    %c3 = arith.constant 3 : index
    %c0_20 = arith.constant 0 : index
    %c0_21 = arith.constant 0 : index
    %25 = vector.load %arg3[%c3, %c0_20, %c0_21] : memref<9x4x128xbf16, #tpu.memory_space<vmem>>, vector<1x4x128xbf16>
    %26 = vector.shape_cast %25 : vector<1x4x128xbf16> to vector<4x128xbf16>
    %cst_22 = arith.constant dense<0.000000e+00> : vector<288x128xf32>
    %27 = tpu.matmul %24, %26, %cst_22 {dimension_numbers = #tpu.dot_dimension_numbers<[1], [0], [0], [1], [0, 0, 1, 1], [], []>} : vector<288x4xbf16>, vector<4x128xbf16>, vector<288x128xf32> -> vector<288x128xf32>
    %28 = arith.addf %21, %27 : vector<288x128xf32>
    %c0_23 = arith.constant 0 : index
    %c19 = arith.constant 19 : index
    %c0_24 = arith.constant 0 : index
    %29 = vector.load %arg2[%c0_23, %c19, %c0_24] : memref<1x328x4xf32, #tpu.memory_space<vmem>>, vector<1x288x4xf32>
    %30 = vector.shape_cast %29 : vector<1x288x4xf32> to vector<288x4xf32>
    %31 = arith.truncf %30 : vector<288x4xf32> to vector<288x4xbf16>
    %c4 = arith.constant 4 : index
    %c0_25 = arith.constant 0 : index
    %c0_26 = arith.constant 0 : index
    %32 = vector.load %arg3[%c4, %c0_25, %c0_26] : memref<9x4x128xbf16, #tpu.memory_space<vmem>>, vector<1x4x128xbf16>
    %33 = vector.shape_cast %32 : vector<1x4x128xbf16> to vector<4x128xbf16>
    %cst_27 = arith.constant dense<0.000000e+00> : vector<288x128xf32>
    %34 = tpu.matmul %31, %33, %cst_27 {dimension_numbers = #tpu.dot_dimension_numbers<[1], [0], [0], [1], [0, 0, 1, 1], [], []>} : vector<288x4xbf16>, vector<4x128xbf16>, vector<288x128xf32> -> vector<288x128xf32>
    %35 = arith.addf %28, %34 : vector<288x128xf32>
    %c0_28 = arith.constant 0 : index
    %c20 = arith.constant 20 : index
    %c0_29 = arith.constant 0 : index
    %36 = vector.load %arg2[%c0_28, %c20, %c0_29] : memref<1x328x4xf32, #tpu.memory_space<vmem>>, vector<1x288x4xf32>
    %37 = vector.shape_cast %36 : vector<1x288x4xf32> to vector<288x4xf32>
    %38 = arith.truncf %37 : vector<288x4xf32> to vector<288x4xbf16>
    %c5 = arith.constant 5 : index
    %c0_30 = arith.constant 0 : index
    %c0_31 = arith.constant 0 : index
    %39 = vector.load %arg3[%c5, %c0_30, %c0_31] : memref<9x4x128xbf16, #tpu.memory_space<vmem>>, vector<1x4x128xbf16>
    %40 = vector.shape_cast %39 : vector<1x4x128xbf16> to vector<4x128xbf16>
    %cst_32 = arith.constant dense<0.000000e+00> : vector<288x128xf32>
    %41 = tpu.matmul %38, %40, %cst_32 {dimension_numbers = #tpu.dot_dimension_numbers<[1], [0], [0], [1], [0, 0, 1, 1], [], []>} : vector<288x4xbf16>, vector<4x128xbf16>, vector<288x128xf32> -> vector<288x128xf32>
    %42 = arith.addf %35, %41 : vector<288x128xf32>
    %c0_33 = arith.constant 0 : index
    %c36 = arith.constant 36 : index
    %c0_34 = arith.constant 0 : index
    %43 = vector.load %arg2[%c0_33, %c36, %c0_34] : memref<1x328x4xf32, #tpu.memory_space<vmem>>, vector<1x288x4xf32>
    %44 = vector.shape_cast %43 : vector<1x288x4xf32> to vector<288x4xf32>
    %45 = arith.truncf %44 : vector<288x4xf32> to vector<288x4xbf16>
    %c6 = arith.constant 6 : index
    %c0_35 = arith.constant 0 : index
    %c0_36 = arith.constant 0 : index
    %46 = vector.load %arg3[%c6, %c0_35, %c0_36] : memref<9x4x128xbf16, #tpu.memory_space<vmem>>, vector<1x4x128xbf16>
    %47 = vector.shape_cast %46 : vector<1x4x128xbf16> to vector<4x128xbf16>
    %cst_37 = arith.constant dense<0.000000e+00> : vector<288x128xf32>
    %48 = tpu.matmul %45, %47, %cst_37 {dimension_numbers = #tpu.dot_dimension_numbers<[1], [0], [0], [1], [0, 0, 1, 1], [], []>} : vector<288x4xbf16>, vector<4x128xbf16>, vector<288x128xf32> -> vector<288x128xf32>
    %49 = arith.addf %42, %48 : vector<288x128xf32>
    %c0_38 = arith.constant 0 : index
    %c37 = arith.constant 37 : index
    %c0_39 = arith.constant 0 : index
    %50 = vector.load %arg2[%c0_38, %c37, %c0_39] : memref<1x328x4xf32, #tpu.memory_space<vmem>>, vector<1x288x4xf32>
    %51 = vector.shape_cast %50 : vector<1x288x4xf32> to vector<288x4xf32>
    %52 = arith.truncf %51 : vector<288x4xf32> to vector<288x4xbf16>
    %c7 = arith.constant 7 : index
    %c0_40 = arith.constant 0 : index
    %c0_41 = arith.constant 0 : index
    %53 = vector.load %arg3[%c7, %c0_40, %c0_41] : memref<9x4x128xbf16, #tpu.memory_space<vmem>>, vector<1x4x128xbf16>
    %54 = vector.shape_cast %53 : vector<1x4x128xbf16> to vector<4x128xbf16>
    %cst_42 = arith.constant dense<0.000000e+00> : vector<288x128xf32>
    %55 = tpu.matmul %52, %54, %cst_42 {dimension_numbers = #tpu.dot_dimension_numbers<[1], [0], [0], [1], [0, 0, 1, 1], [], []>} : vector<288x4xbf16>, vector<4x128xbf16>, vector<288x128xf32> -> vector<288x128xf32>
    %56 = arith.addf %49, %55 : vector<288x128xf32>
    %c0_43 = arith.constant 0 : index
    %c38 = arith.constant 38 : index
    %c0_44 = arith.constant 0 : index
    %57 = vector.load %arg2[%c0_43, %c38, %c0_44] : memref<1x328x4xf32, #tpu.memory_space<vmem>>, vector<1x288x4xf32>
    %58 = vector.shape_cast %57 : vector<1x288x4xf32> to vector<288x4xf32>
    %59 = arith.truncf %58 : vector<288x4xf32> to vector<288x4xbf16>
    %c8 = arith.constant 8 : index
    %c0_45 = arith.constant 0 : index
    %c0_46 = arith.constant 0 : index
    %60 = vector.load %arg3[%c8, %c0_45, %c0_46] : memref<9x4x128xbf16, #tpu.memory_space<vmem>>, vector<1x4x128xbf16>
    %61 = vector.shape_cast %60 : vector<1x4x128xbf16> to vector<4x128xbf16>
    %cst_47 = arith.constant dense<0.000000e+00> : vector<288x128xf32>
    %62 = tpu.matmul %59, %61, %cst_47 {dimension_numbers = #tpu.dot_dimension_numbers<[1], [0], [0], [1], [0, 0, 1, 1], [], []>} : vector<288x4xbf16>, vector<4x128xbf16>, vector<288x128xf32> -> vector<288x128xf32>
    %63 = arith.addf %56, %62 : vector<288x128xf32>
    %c0_48 = arith.constant 0 : index
    %c0_49 = arith.constant 0 : index
    %64 = vector.load %arg4[%c0_48, %c0_49] : memref<1x128xf32, #tpu.memory_space<vmem>>, vector<1x128xf32>
    %65 = vector.broadcast %64 : vector<1x128xf32> to vector<288x128xf32>
    %66 = arith.addf %63, %65 : vector<288x128xf32>
    %cst_50 = arith.constant 0.000000e+00 : f32
    %67 = vector.broadcast %cst_50 : f32 to vector<288x128xf32>
    %68 = arith.maximumf %66, %67 : vector<288x128xf32>
    %c0_51 = arith.constant 0 : index
    %c0_52 = arith.constant 0 : index
    %c0_53 = arith.constant 0 : index
    %69 = vector.load %arg5[%c0_51, %c0_52, %c0_53] : memref<1x288x128xf32, #tpu.memory_space<vmem>>, vector<1x288x128xf32>
    %70 = vector.shape_cast %69 : vector<1x288x128xf32> to vector<288x128xf32>
    %71 = vector.shape_cast %68 : vector<288x128xf32> to vector<1x288x128xf32>
    tpu.vector_store %arg5[%c0_51, %c0_52, %c0_53], %71 {strides = array<i32>} : memref<1x288x128xf32, #tpu.memory_space<vmem>>, vector<1x288x128xf32>,
    return
  }
  func.func @transform_0(%arg0: i32, %arg1: i32) -> (i32, i32, i32) {
    %c0_i32 = arith.constant 0 : i32
    %c0_i32_0 = arith.constant 0 : i32
    %c0_i32_1 = arith.constant 0 : i32
    return %arg0, %c0_i32, %c0_i32_0 : i32, i32, i32
  }
  func.func @transform_1(%arg0: i32, %arg1: i32) -> (i32, i32, i32) {
    %c0_i32 = arith.constant 0 : i32
    %c0_i32_0 = arith.constant 0 : i32
    %c0_i32_1 = arith.constant 0 : i32
    return %c0_i32, %c0_i32_0, %arg1 : i32, i32, i32
  }
  func.func @transform_2(%arg0: i32, %arg1: i32) -> (i32, i32) {
    %c0_i32 = arith.constant 0 : i32
    %c0_i32_0 = arith.constant 0 : i32
    return %c0_i32, %arg1 : i32, i32
  }
  func.func @transform_3(%arg0: i32, %arg1: i32) -> (i32, i32, i32) {
    %c0_i32 = arith.constant 0 : i32
    %c0_i32_0 = arith.constant 0 : i32
    return %arg0, %c0_i32, %arg1 : i32, i32, i32
  }
}

</mosaic_0001>

<bundles_post_ra>
// kernel: tpu_custom_call.1
= control target key start
LH: loop header
LB: loop body
LE: loop exit
PB: predicated region body
PF: predicated region fallthrough
CT: control target
= control target key end

     0   :  { %8 = vsyncpa [#allocation3], 0  ;;  %s3903_s0 = inlined_call_operand.vmem [shape: f32[2,328,4], index: 0, kind: input, shape index: {}]   ;;  %s3904_s1 = inlined_call_operand.vmem [shape: bf16[9,4,128], index: 1, kind: input, shape index: {}]   ;;  %s3905_s2 = inlined_call_operand.vmem [shape: f32[1,128], index: 2, kind: input, shape index: {}]   ;;  %s3906_s3 = inlined_call_operand.hbm [shape: f32[2,288,128], index: 3, kind: output, shape index: {}]  }
   0x1   :  { %10 = vsyncpa [#allocation3 + $0x1], 0  ;;  %s2951_s12 = smov 0   ;;  %s2953_s13 = smov 0  }
   0x2   :  { %s2955_s14 = smov 0   ;;  %s2957_s15 = smov 0  }
   0x3   :  { %s2959_s16 = smov 0   ;;  %s2961_s17 = smov 0  }
   0x4 LB: > { %s2604_s18 = sadd.s32 4294967295, %s2927_s17   ;;  %s2605_s19 = sadd.s32 4294967294, %s2927_s17   ;;  %s2927_s17 = sphi %s2961_s17, %s16_s17   ;;  %s2923_s16 = sphi %s2959_s16, %s3913_s16   ;;  %s2919_s15 = sphi %s2957_s15, %s3912_s15   ;;  %s2915_s14 = sphi %s2955_s14, %s3911_s14   ;;  %s2911_s13 = sphi %s2953_s13, %s3910_s13   ;;  %s2907_s12 = sphi %s2951_s12, %s3909_s12  }
   0x5   : > { %s28_s20 = sadd.s32 1, %s2923_s16  ;;  %s115_s21 = sadd.s32 1, %s2915_s14 }
   0x6   : > { %p30_p0 = scmp.ge.s32.totalorder %s28_s20, 2  ;;  %p125_p1 = scmp.ne.s32.totalorder %s2915_s14, %s2911_s13 }
   0x7   : > { %p126_p2 = scmp.eq.s32.totalorder %s2604_s18, 1  ;;  %p131_p3 = scmp.ne.s32.totalorder %s2911_s13, %s2907_s12 }
   0x8   : > { %s3915_s20 = smov (%p30_p0, %s28_s20), 0  ;;  %p132_p5 = scmp.eq.s32.totalorder %s2605_s19, 1 }
   0x9   : > { %p2991_p4 = por %p126_p2, %p125_p1  ;;  %s110_s23 = ssub.s32 %s2923_s16, %s3915_s20 }
   0xa   : > { %p2610_p6 = scmp.ge.s32.totalorder %s2927_s17, 1  ;;  %p113_p7 = scmp.eq.s32.totalorder %s110_s23, 0 }
   0xb   : > { %p2998_p8 = por %p132_p5, %p131_p3  ;;  %p171_p9 = scmp.lt.s32.totalorder %s2927_s17, 3 }
   0xc   : > { %s3004_s25 = scalar_select %p113_p7, %s2915_s14, %s115_s21  }
   0xd   : > { %p172_p10 = pnand %p2610_p6, %p171_p9 }
   0xe   : > { %p202_p11 = scmp.lt.s32.totalorder (!%p172_p10), %s2919_s15, 1  ;;  %s2790_s10 = smul.u32 (!%p172_p10), 288, %s2919_s15 }
   0xf   : > { %175 = sbr.rel (%p172_p10) target bundleno = 823 (0x337), region = 32  ;;  %s2869_s30 = scalar_lea.hbm (!%p172_p10), %s3906_s3, 576 }
  0x10   : > { %s2501_s19 = scalar_lea.hbm (!%p172_p10), %s3906_s3, %s2790_s10 }
  0x11   : > { %s2504_s21 = sshll.u32 (!%p172_p10), %s2501_s19, 4  ;;  %s2505_s21 = int_to_ptr.hbm [resolvable:$true] %s2504_s21 }
  0x12   : > { %s2863_s26 = sshra.s32 (!%p172_p10), %s2505_s21, 4  ;;  %s2864_s26 = int_to_ptr.hbm [resolvable:$true] %s2863_s26 }
  0x13   : > { %s2865_s27 = scalar_lea.hbm (!%p172_p10), %s2864_s26, 288  ;;  %p2870_p1 = scmp.lt.s32.totalorder (!%p172_p10), %s2864_s26, %s3906_s3 }
  0x14   : > { %v2612_v0 = vld [vmem:[%s3904_s1 + $0x2] sm:$0x3]  ;;  %vm381_vm0 = vcmask 1041408   ;;  %v2649_v2 = vld [vmem:[%s3904_s1 + $0x4] sm:$0x3]  ;;  %s203_s5 = scalar_select %p202_p11, %s2919_s15, 1 }
  0x15   : > { %v383_v1 = vsel %vm381_vm0, %v2612_v0, 0  ;;  %v269_v3 = vld [vmem:[%s3904_s1] sm:$0x3]  ;;  %v751_v4 = vsel %vm381_vm0, %v2649_v2, 0  ;;  %v2687_v6 = vld [vmem:[%s3904_s1 + $0x8] sm:$0x3]  ;;  %p2866_p12 = scmp.ne.s32.totalorder %s2864_s26, %s2865_s27  ;;  %p2871_p2 = scmp.lt.s32.totalorder %s2869_s30, %s2865_s27 }
  0x16   : > { %2785 = vmatpush.bf16.msra.mxu1 %v383_v1  ;;  %2786 = vmatpush.bf16.msra.mxu2 %v383_v1  ;;  %v539_v5 = vsel %vm381_vm0, %v269_v3, 0  ;;  %v1247_v7 = vsel %vm381_vm0, %v2687_v6, 0  ;;  %s2789_s8 = smul.u32 328, %s203_s5  ;;  %vm326_vm1 = vcmask 31744   ;;  %v2668_v20 = vld [vmem:[%s3904_s1 + $0x6] sm:$0x3] }
  0x17   : > { %392 = vmatpush.bf16.msra.mxu0 %v383_v1  ;;  %2787 = vmatpush.bf16.msra.mxu3 %v383_v1  ;;  %v999_v21 = vsel %vm381_vm0, %v2668_v20, 0  ;;  %v2725_v58 = vld [vmem:[%s3904_s1 + $0xc] sm:$0x3]  ;;  %v2744_v59 = vld [vmem:[%s3904_s1 + $0xe] sm:$0x3]  ;;  %s199_s5 = sand.u32 1, %s2911_s13   ;;  %p2867_p13 = pnand %p2866_p12, %p2991_p4 }
  0x18   : > { %s3027_s11 = scalar_lea.vmem %s3903_s0, %s2789_s8  ;;  %v2706_v60 = vld [vmem:[%s3904_s1 + $0xa] sm:$0x3]  ;;  %v1743_v61 = vsel %vm381_vm0, %v2725_v58, 0  ;;  %v1991_v62 = vsel %vm381_vm0, %v2744_v59, 0  ;;  %v2763_v0 = vld [vmem:[%s3904_s1 + $0x10] sm:$0x3]  ;;  %p2872_p3 = por %p2871_p2, %p2870_p1 }
  0x19   : > { %v280_v8 = vld [vmem:[%s3027_s11 + $0x51] sm:$0xff]  ;;  %v281_v9 = vld [vmem:[%s3027_s11 + $0x59] sm:$0xff]  ;;  %v290_v10 = vld [vmem:[%s3027_s11 + $0xa1] sm:$0xff]  ;;  %v1495_v63 = vsel %vm381_vm0, %v2706_v60, 0  ;;  %v2239_v1 = vsel %vm381_vm0, %v2763_v0, 0  ;;  %s2788_s8 = smul.u32 288, %s199_s5  ;;  %p2868_p0 = pneg %p2867_p13 }
  0x1a   : > { %760 = vmatpush.bf16.msrb.mxu2 %v751_v4  ;;  %548 = vmatpush.bf16.msrb.mxu1 %v539_v5  ;;  %v311_v11 = vpack.c.bf16 %v281_v9, %v280_v8  ;;  %v291_v12 = vld [vmem:[%s3027_s11 + $0xa9] sm:$0xff]  ;;  %v270_v13 = vld [vmem:[%s3027_s11 + $0x1] sm:$0xff]  ;;  %v300_v17 = vld [vmem:[%s3027_s11 + $0xf1] sm:$0xff]  ;;  %s2489_s23 = scalar_lea.sflag [#allocation3], %s199_s5 }
  0x1b   : > { %1256 = vmatpush.bf16.msrb.mxu0 %v1247_v7  ;;  %v271_v14 = vld [vmem:[%s3027_s11 + $0x9] sm:$0xff]  ;;  %v316_v15 = vpack.c.bf16 %v291_v12, %v290_v10  ;;  %v301_v18 = vld [vmem:[%s3027_s11 + $0xf9] sm:$0xff]  ;;  %1008 = vmatpush.bf16.msrb.mxu3 %v999_v21  ;;  %v282_v22 = vld [vmem:[%s3027_s11 + $0x61] sm:$0xff]  ;;  %s3636_s9 = scalar_lea.vmem [#allocation2], %s2788_s8  ;;  %p2873_p5 = pnand %p2872_p3, %p2868_p0 }
  0x1c   : > { %v306_v16 = vpack.c.bf16 %v271_v14, %v270_v13  ;;  %2618 = vmatmul.msk.bf16.vlgmr.msra.gmra.mxu1 %vm326_vm1, %v311_v11  ;;  %v321_v19 = vpack.c.bf16 %v301_v18, %v300_v17  ;;  %v283_v23 = vld [vmem:[%s3027_s11 + $0x69] sm:$0xff]  ;;  %v292_v24 = vld [vmem:[%s3027_s11 + $0xb1] sm:$0xff]  ;;  %v293_v25 = vld [vmem:[%s3027_s11 + $0xb9] sm:$0xff]  ;;  %s2502_s15 = sshll.u32 %s3636_s9, 4  ;;  %s2503_s15 = int_to_ptr.vmem [resolvable:$true] %s2502_s15 }
  0x1d   : > { %2623 = vmatmul.msk.bf16.vlgmr.msra.gmra.mxu2 %vm326_vm1, %v316_v15  ;;  %v272_v26 = vld [vmem:[%s3027_s11 + $0x11] sm:$0xff]  ;;  %v273_v27 = vld [vmem:[%s3027_s11 + $0x19] sm:$0xff]  ;;  %v312_v28 = vpack.c.bf16 %v283_v23, %v282_v22  ;;  %v317_v29 = vpack.c.bf16 %v293_v25, %v292_v24  ;;  %v302_v31 = vld [vmem:[%s3027_s11 + $0x101] sm:$0xff] }
  0x1e   : > { %2613 = vmatmul.msk.bf16.vlgmr.msra.gmra.mxu0 %vm326_vm1, %v306_v16  ;;  %2628 = vmatmul.msk.bf16.vlgmr.msra.gmra.mxu3 %vm326_vm1, %v321_v19  ;;  %v307_v30 = vpack.c.bf16 %v273_v27, %v272_v26  ;;  %v303_v32 = vld [vmem:[%s3027_s11 + $0x109] sm:$0xff]  ;;  %v284_v34 = vld [vmem:[%s3027_s11 + $0x71] sm:$0xff]  ;;  %v285_v35 = vld [vmem:[%s3027_s11 + $0x79] sm:$0xff] }
  0x1f   : > { %v322_v33 = vpack.c.bf16 %v303_v32, %v302_v31  ;;  %v294_v36 = vld [vmem:[%s3027_s11 + $0xc1] sm:$0xff]  ;;  %v295_v37 = vld [vmem:[%s3027_s11 + $0xc9] sm:$0xff]  ;;  %v313_v40 = vpack.c.bf16 %v285_v35, %v284_v34  ;;  %v304_v43 = vld [vmem:[%s3027_s11 + $0x111] sm:$0xff]  ;;  %1752 = vmatpush.bf16.msra.mxu2 %v1743_v61  ;;  %2000 = vmatpush.bf16.msra.mxu3 %v1991_v62 }
  0x20   : > { %v274_v38 = vld [vmem:[%s3027_s11 + $0x21] sm:$0xff]  ;;  %v275_v39 = vld [vmem:[%s3027_s11 + $0x29] sm:$0xff]  ;;  %v318_v41 = vpack.c.bf16 %v295_v37, %v294_v36  ;;  %v305_v44 = vld [vmem:[%s3027_s11 + $0x119] sm:$0xff]  ;;  %1504 = vmatpush.bf16.msra.mxu1 %v1495_v63  ;;  %2248 = vmatpush.bf16.msra.mxu0 %v2239_v1 }
  0x21   : > { %v308_v42 = vpack.c.bf16 %v275_v39, %v274_v38  ;;  %v323_v45 = vpack.c.bf16 %v305_v44, %v304_v43  ;;  %v286_v46 = vld [vmem:[%s3027_s11 + $0x81] sm:$0xff]  ;;  %v287_v47 = vld [vmem:[%s3027_s11 + $0x89] sm:$0xff]  ;;  %v296_v48 = vld [vmem:[%s3027_s11 + $0xd1] sm:$0xff] }
  0x22   : > { %v297_v49 = vld [vmem:[%s3027_s11 + $0xd9] sm:$0xff]  ;;  %v276_v50 = vld [vmem:[%s3027_s11 + $0x31] sm:$0xff]  ;;  %v314_v52 = vpack.c.bf16 %v287_v47, %v286_v46  ;;  %v298_v4 = vld [vmem:[%s3027_s11 + $0xe1] sm:$0xff] }
  0x23   : > { %v277_v51 = vld [vmem:[%s3027_s11 + $0x39] sm:$0xff]  ;;  %v319_v53 = vpack.c.bf16 %v297_v49, %v296_v48  ;;  %v288_v2 = vld [vmem:[%s3027_s11 + $0x91] sm:$0xff]  ;;  %v299_v5 = vld [vmem:[%s3027_s11 + $0xe9] sm:$0xff] }
  0x24   : > { %v309_v54 = vpack.c.bf16 %v277_v51, %v276_v50  ;;  %v888_v55 = vld [vmem:[%s3027_s11 + $0x12] sm:$0xff]  ;;  %v889_v56 = vld [vmem:[%s3027_s11 + $0x1a] sm:$0xff]  ;;  %v279_v7 = vld [vmem:[%s3027_s11 + $0x49] sm:$0xff]  ;;  %v320_v9 = vpack.c.bf16 %v299_v5, %v298_v4 }
  0x25   : > { %v924_v57 = vpack.c.bf16 %v889_v56, %v888_v55  ;;  %v289_v3 = vld [vmem:[%s3027_s11 + $0x99] sm:$0xff]  ;;  %v278_v6 = vld [vmem:[%s3027_s11 + $0x41] sm:$0xff]  ;;  %v891_v12 = vld [vmem:[%s3027_s11 + $0x2a] sm:$0xff] }
  0x26   : > { %v315_v8 = vpack.c.bf16 %v289_v3, %v288_v2  ;;  %v310_v10 = vpack.c.bf16 %v279_v7, %v278_v6  ;;  %v890_v11 = vld [vmem:[%s3027_s11 + $0x22] sm:$0xff]  ;;  %v641_v17 = vld [vmem:[%s3027_s11 + $0xa] sm:$0xff]  ;;  %v1136_v18 = vld [vmem:[%s3027_s11 + $0x13] sm:$0xff] }
  0x27   : > { %v925_v13 = vpack.c.bf16 %v891_v12, %v890_v11  ;;  %v215_v14 = vld [vmem:[%s3027_s11] sm:$0xff]  ;;  %v216_v15 = vld [vmem:[%s3027_s11 + $0x8] sm:$0xff]  ;;  %v892_v23 = vld [vmem:[%s3027_s11 + $0x32] sm:$0xff] }
  0x28   : > { %v640_v16 = vld [vmem:[%s3027_s11 + $0x2] sm:$0xff]  ;;  %v251_v20 = vpack.c.bf16 %v216_v15, %v215_v14  ;;  %v893_v24 = vld [vmem:[%s3027_s11 + $0x3a] sm:$0xff]  ;;  %v217_v26 = vld [vmem:[%s3027_s11 + $0x10] sm:$0xff] }
  0x29   : > { %v1137_v19 = vld [vmem:[%s3027_s11 + $0x1b] sm:$0xff]  ;;  %v676_v21 = vpack.c.bf16 %v641_v17, %v640_v16  ;;  %v926_v25 = vpack.c.bf16 %v893_v24, %v892_v23  ;;  %v220_v36 = vld [vmem:[%s3027_s11 + $0x28] sm:$0xff]  ;;  %v1140_v37 = vld [vmem:[%s3027_s11 + $0x33] sm:$0xff] }
  0x2a   : > { %v1172_v22 = vpack.c.bf16 %v1137_v19, %v1136_v18  ;;  %v218_v27 = vld [vmem:[%s3027_s11 + $0x18] sm:$0xff]  ;;  %v894_v32 = vld [vmem:[%s3027_s11 + $0x42] sm:$0xff]  ;;  %v221_v44 = vld [vmem:[%s3027_s11 + $0x30] sm:$0xff] }
  0x2b   : > { %v219_v35 = vld [vmem:[%s3027_s11 + $0x20] sm:$0xff]  ;;  %v1143_v47 = vld [vmem:[%s3027_s11 + $0x4b] sm:$0xff]  ;;  %v1144_v61 = vld [vmem:[%s3027_s11 + $0x53] sm:$0xff] }
  0x2c   : > { %2619 = vmatmul.msk.bf16.gmra.mxu1 %vm326_vm1, %v312_v28  ;;  %v1138_v28 = vld [vmem:[%s3027_s11 + $0x23] sm:$0xff]  ;;  %v1141_v38 = vld [vmem:[%s3027_s11 + $0x3b] sm:$0xff]  ;;  %v253_v39 = vpack.c.bf16 %v220_v36, %v219_v35  ;;  %v900_v3 = vld [vmem:[%s3027_s11 + $0x72] sm:$0xff] }
  0x2d   : > { %2624 = vmatmul.msk.bf16.gmra.mxu2 %vm326_vm1, %v317_v29  ;;  %v1139_v29 = vld [vmem:[%s3027_s11 + $0x2b] sm:$0xff]  ;;  %v1142_v46 = vld [vmem:[%s3027_s11 + $0x43] sm:$0xff]  ;;  %v1145_v62 = vld [vmem:[%s3027_s11 + $0x5b] sm:$0xff] }
  0x2e   : > { %2614 = vmatmul.msk.bf16.gmra.mxu0 %vm326_vm1, %v307_v30  ;;  %2629 = vmatmul.msk.bf16.gmra.mxu3 %vm326_vm1, %v322_v33  ;;  %v252_v30 = vpack.c.bf16 %v218_v27, %v217_v26  ;;  %v1173_v31 = vpack.c.bf16 %v1139_v29, %v1138_v28  ;;  %v895_v33 = vld [vmem:[%s3027_s11 + $0x4a] sm:$0xff]  ;;  %v1175_v50 = vpack.c.bf16 %v1143_v47, %v1142_v46  ;;  %v898_v51 = vld [vmem:[%s3027_s11 + $0x62] sm:$0xff]  ;;  %v901_v4 = vld [vmem:[%s3027_s11 + $0x7a] sm:$0xff] }
  0x2f   : > { %v927_v34 = vpack.c.bf16 %v895_v33, %v894_v32  ;;  %v223_v59 = vld [vmem:[%s3027_s11 + $0x40] sm:$0xff]  ;;  %v224_v60 = vld [vmem:[%s3027_s11 + $0x48] sm:$0xff]  ;;  %v1176_v2 = vpack.c.bf16 %v1145_v62, %v1144_v61  ;;  %v3181_v7 = vpack.c.bf16 %v901_v4, %v900_v3  ;;  %v225_v12 = vld [vmem:[%s3027_s11 + $0x50] sm:$0xff] }
  0x30   : > { %v255_v0 = vpack.c.bf16 %v224_v60, %v223_v59  ;;  %v1146_v14 = vld [vmem:[%s3027_s11 + $0x63] sm:$0xff]  ;;  %v1147_v15 = vld [vmem:[%s3027_s11 + $0x6b] sm:$0xff]  ;;  %v1149_v32 = vld [vmem:[%s3027_s11 + $0x7b] sm:$0xff] }
  0x31   : > { %v1177_v19 = vpack.c.bf16 %v1147_v15, %v1146_v14  ;;  %v227_v29 = vld [vmem:[%s3027_s11 + $0x60] sm:$0xff]  ;;  %v229_v46 = vld [vmem:[%s3027_s11 + $0x70] sm:$0xff]  ;;  %v230_v47 = vld [vmem:[%s3027_s11 + $0x78] sm:$0xff] }
  0x32   : > { %v906_v60 = vld [vmem:[%s3027_s11 + $0xa2] sm:$0xff]  ;;  %v907_v61 = vld [vmem:[%s3027_s11 + $0xaa] sm:$0xff] }
  0x33   : > { %v231_v14 = vld [vmem:[%s3027_s11 + $0x80] sm:$0xff]  ;;  %v232_v15 = vld [vmem:[%s3027_s11 + $0x88] sm:$0xff] }
  0x3c   : > { %2620 = vmatmul.msk.bf16.gmra.mxu1 %vm326_vm1, %v313_v40  ;;  %v1174_v40 = vpack.c.bf16 %v1141_v38, %v1140_v37  ;;  %v904_v37 = vld [vmem:[%s3027_s11 + $0x92] sm:$0xff]  ;;  %v905_v38 = vld [vmem:[%s3027_s11 + $0x9a] sm:$0xff] }
  0x3d   : > { %2625 = vmatmul.msk.bf16.gmra.mxu2 %vm326_vm1, %v318_v41  ;;  %v896_v41 = vld [vmem:[%s3027_s11 + $0x52] sm:$0xff] }
  0x3e   : > { %2615 = vmatmul.msk.bf16.gmra.mxu0 %vm326_vm1, %v308_v42  ;;  %2630 = vmatmul.msk.bf16.gmra.mxu3 %vm326_vm1, %v323_v45  ;;  %v897_v42 = vld [vmem:[%s3027_s11 + $0x5a] sm:$0xff] }
  0x3f   : > { %v928_v43 = vpack.c.bf16 %v897_v42, %v896_v41  ;;  %v222_v45 = vld [vmem:[%s3027_s11 + $0x38] sm:$0xff]  ;;  %v3239_v41 = vpack.c.bf16 %v905_v38, %v904_v37 }
  0x40   : > { %v254_v48 = vpack.c.bf16 %v222_v45, %v221_v44 }
  0x4c   : > { %2621 = vmatmul.msk.bf16.gmra.mxu1 %vm326_vm1, %v314_v52  ;;  %v899_v52 = vld [vmem:[%s3027_s11 + $0x6a] sm:$0xff] }
  0x4d   : > { %2626 = vmatmul.msk.bf16.gmra.mxu2 %vm326_vm1, %v319_v53 }
  0x4e   : > { %2616 = vmatmul.msk.bf16.gmra.mxu0 %vm326_vm1, %v309_v54  ;;  %2669 = vmatmul.msk.bf16.vlgmr.msrb.gmra.mxu3 %vm326_vm1, %v924_v57  ;;  %v3152_v54 = vpack.c.bf16 %v899_v52, %v898_v51  ;;  %v258_v52 = vpack.c.bf16 %v230_v47, %v229_v46 }
  0x5c   : > { %2622 = vmatmul.msk.bf16.gmra.mxu1 %vm326_vm1, %v315_v8 }
  0x5d   : > { %2627 = vmatmul.msk.bf16.gmra.mxu2 %vm326_vm1, %v320_v9 }
  0x5e   : > { %2617 = vmatmul.msk.bf16.gmra.mxu0 %vm326_vm1, %v310_v10  ;;  %2670 = vmatmul.msk.bf16.gmra.mxu3 %vm326_vm1, %v925_v13 }
  0x6c   : > { %2631 = vmatmul.msk.bf16.vlgmr.msrb.gmra.mxu1 %vm326_vm1, %v251_v20  ;;  %v902_v20 = vld [vmem:[%s3027_s11 + $0x82] sm:$0xff] }
  0x6d   : > { %2650 = vmatmul.msk.bf16.vlgmr.msrb.gmra.mxu2 %vm326_vm1, %v676_v21  ;;  %v903_v21 = vld [vmem:[%s3027_s11 + $0x8a] sm:$0xff] }
  0x6e   : > { %2688 = vmatmul.msk.bf16.vlgmr.msrb.gmra.mxu0 %vm326_vm1, %v1172_v22  ;;  %2671 = vmatmul.msk.bf16.gmra.mxu3 %vm326_vm1, %v926_v25  ;;  %v3210_v24 = vpack.c.bf16 %v903_v21, %v902_v20 }
  0x7c   : > { %2632 = vmatmul.msk.bf16.gmra.mxu1 %vm326_vm1, %v252_v30  ;;  %v228_v30 = vld [vmem:[%s3027_s11 + $0x68] sm:$0xff] }
  0x7d   : > { %2651 = vmatmul.msk.bf16.gmra.mxu2 %vm326_vm1, %v924_v57 }
  0x7e   : > { %2689 = vmatmul.msk.bf16.gmra.mxu0 %vm326_vm1, %v1173_v31  ;;  %2672 = vmatmul.msk.bf16.gmra.mxu3 %vm326_vm1, %v927_v34  ;;  %v1148_v31 = vld [vmem:[%s3027_s11 + $0x73] sm:$0xff] }
  0x7f   : > { %v1178_v36 = vpack.c.bf16 %v1149_v32, %v1148_v31  ;;  %v909_v31 = vld [vmem:[%s3027_s11 + $0xba] sm:$0xff] }
  0x8c   : > { %2633 = vmatmul.msk.bf16.gmra.mxu1 %vm326_vm1, %v253_v39 }
  0x8d   : > { %2652 = vmatmul.msk.bf16.gmra.mxu2 %vm326_vm1, %v925_v13  ;;  %v226_v13 = vld [vmem:[%s3027_s11 + $0x58] sm:$0xff] }
  0x8e   : > { %2690 = vmatmul.msk.bf16.gmra.mxu0 %vm326_vm1, %v1174_v40  ;;  %2673 = vmatmul.msk.bf16.gmra.mxu3 %vm326_vm1, %v928_v43  ;;  %v256_v17 = vpack.c.bf16 %v226_v13, %v225_v12 }
  0x99   : > { %v3145_v49 = vpop.f32.mrf.mxu1 }
  0x9b   : > { %v3149_v53 = vpop.f32.mrf.mxu0 }
  0x9c   : > { %2634 = vmatmul.msk.bf16.gmra.mxu1 %vm326_vm1, %v254_v48  ;;  %v1150_v48 = vld [vmem:[%s3027_s11 + $0x83] sm:$0xff] }
  0x9d   : > { %2653 = vmatmul.msk.bf16.gmra.mxu2 %vm326_vm1, %v926_v25 }
  0x9e   : > { %2691 = vmatmul.msk.bf16.gmra.mxu0 %vm326_vm1, %v1175_v50  ;;  %2674 = vmatmul.msk.bf16.gmra.mxu3 %vm326_vm1, %v3152_v54  ;;  %v1151_v50 = vld [vmem:[%s3027_s11 + $0x8b] sm:$0xff] }
  0x9f   : > { %v1179_v59 = vpack.c.bf16 %v1151_v50, %v1150_v48 }
  0xa0   : > { %v3156_v55 = vpop.f32.mrf.mxu2 }
  0xa1   : > { %v3160_v56 = vpop.f32.mrf.mxu1  ;;  %v3164_v58 = vpop.f32.mrf.mxu3 }
  0xa3   : > { %v3162_v57 = vpop.f32.mrf.mxu0 }
  0xa8   : > { %v3170_v63 = vpop.f32.mrf.mxu2 }
  0xa9   : > { %v3172_v1 = vpop.f32.mrf.mxu1  ;;  %v3178_v6 = vpop.f32.mrf.mxu3 }
  0xab   : > { %v3176_v5 = vpop.f32.mrf.mxu0 }
  0xac   : > { %2635 = vmatmul.msk.bf16.gmra.mxu1 %vm326_vm1, %v255_v0 }
  0xad   : > { %2654 = vmatmul.msk.bf16.gmra.mxu2 %vm326_vm1, %v927_v34  ;;  %v257_v34 = vpack.c.bf16 %v228_v30, %v227_v29  ;;  %v908_v30 = vld [vmem:[%s3027_s11 + $0xb2] sm:$0xff] }
  0xae   : > { %2692 = vmatmul.msk.bf16.gmra.mxu0 %vm326_vm1, %v1176_v2  ;;  %2675 = vmatmul.msk.bf16.gmra.mxu3 %vm326_vm1, %v3181_v7  ;;  %v3265_v2 = vpack.c.bf16 %v907_v61, %v906_v60  ;;  %v234_v60 = vld [vmem:[%s3027_s11 + $0x98] sm:$0xff] }
  0xb0   : > { %v3185_v8 = vpop.f32.mrf.mxu2 }
  0xb1   : > { %v3189_v9 = vpop.f32.mrf.mxu1  ;;  %v3193_v11 = vpop.f32.mrf.mxu3 }
  0xb3   : > { %v3191_v10 = vpop.f32.mrf.mxu0 }
  0xb8   : > { %v3199_v16 = vpop.f32.mrf.mxu2 }
  0xb9   : > { %v3201_v18 = vpop.f32.mrf.mxu1  ;;  %v3207_v23 = vpop.f32.mrf.mxu3 }
  0xbb   : > { %v3205_v22 = vpop.f32.mrf.mxu0 }
  0xbc   : > { %2636 = vmatmul.msk.bf16.gmra.mxu1 %vm326_vm1, %v256_v17  ;;  %v1152_v17 = vld [vmem:[%s3027_s11 + $0x93] sm:$0xff] }
  0xbd   : > { %2655 = vmatmul.msk.bf16.gmra.mxu2 %vm326_vm1, %v928_v43 }
  0xbe   : > { %2693 = vmatmul.msk.bf16.gmra.mxu0 %vm326_vm1, %v1177_v19  ;;  %2676 = vmatmul.msk.bf16.gmra.mxu3 %vm326_vm1, %v3210_v24  ;;  %v1153_v19 = vld [vmem:[%s3027_s11 + $0x9b] sm:$0xff] }
  0xbf   : > { %v1180_v29 = vpack.c.bf16 %v1153_v19, %v1152_v17 }
  0xc0   : > { %v3214_v25 = vpop.f32.mrf.mxu2 }
  0xc1   : > { %v3218_v26 = vpop.f32.mrf.mxu1  ;;  %v3222_v28 = vpop.f32.mrf.mxu3 }
  0xc3   : > { %v3220_v27 = vpop.f32.mrf.mxu0 }
  0xc8   : > { %v3228_v33 = vpop.f32.mrf.mxu2 }
  0xc9   : > { %v3230_v35 = vpop.f32.mrf.mxu1  ;;  %v3236_v40 = vpop.f32.mrf.mxu3 }
  0xcb   : > { %v3234_v39 = vpop.f32.mrf.mxu0 }
  0xcc   : > { %2637 = vmatmul.msk.bf16.gmra.mxu1 %vm326_vm1, %v257_v34 }
  0xcd   : > { %2656 = vmatmul.msk.bf16.gmra.mxu2 %vm326_vm1, %v3152_v54 }
  0xce   : > { %2694 = vmatmul.msk.bf16.gmra.mxu0 %vm326_vm1, %v1178_v36  ;;  %2677 = vmatmul.msk.bf16.gmra.mxu3 %vm326_vm1, %v3239_v41  ;;  %v3287_v36 = vpack.c.bf16 %v909_v31, %v908_v30  ;;  %v911_v30 = vld [vmem:[%s3027_s11 + $0xca] sm:$0xff] }
  0xd0   : > { %v3244_v42 = vpop.f32.mrf.mxu2 }
  0xd1   : > { %v3248_v43 = vpop.f32.mrf.mxu1  ;;  %v1010_v45 = vpop.f32.mrf.mxu3 }
  0xd3   : > { %v3250_v44 = vpop.f32.mrf.mxu0 }
  0xd8   : > { %v3256_v51 = vpop.f32.mrf.mxu2 }
  0xd9   : > { %v3258_v54 = vpop.f32.mrf.mxu1  ;;  %v1012_v0 = vpop.f32.mrf.mxu3 }
  0xdb   : > { %v3262_v62 = vpop.f32.mrf.mxu0 }
  0xdc   : > { %2638 = vmatmul.msk.bf16.gmra.mxu1 %vm326_vm1, %v258_v52 }
  0xdd   : > { %2657 = vmatmul.msk.bf16.gmra.mxu2 %vm326_vm1, %v3181_v7  ;;  %v259_v7 = vpack.c.bf16 %v232_v15, %v231_v14  ;;  %v1155_v14 = vld [vmem:[%s3027_s11 + $0xab] sm:$0xff] }
  0xde   : > { %2695 = vmatmul.msk.bf16.gmra.mxu0 %vm326_vm1, %v1179_v59  ;;  %2678 = vmatmul.msk.bf16.gmra.mxu3 %vm326_vm1, %v3265_v2  ;;  %v233_v59 = vld [vmem:[%s3027_s11 + $0x90] sm:$0xff] }
  0xdf   : > { %v260_v17 = vpack.c.bf16 %v234_v60, %v233_v59 }
  0xe0   : > { %v3270_v3 = vpop.f32.mrf.mxu2 }
  0xe1   : > { %v3274_v4 = vpop.f32.mrf.mxu1  ;;  %v1015_v13 = vpop.f32.mrf.mxu3 }
  0xe3   : > { %v3276_v12 = vpop.f32.mrf.mxu0 }
  0xe8   : > { %v3282_v20 = vpop.f32.mrf.mxu2 }
  0xe9   : > { %v550_v21 = vpop.f32.mrf.mxu1  ;;  %v1017_v34 = vpop.f32.mrf.mxu3 }
  0xea   : > { %v551_v37 = vadd.f32 %v550_v21, %v3149_v53 }
  0xeb   : > { %v1258_v32 = vpop.f32.mrf.mxu0 }
  0xec   : > { %2639 = vmatmul.msk.bf16.gmra.mxu1 %vm326_vm1, %v259_v7 }
  0xed   : > { %2658 = vmatmul.msk.bf16.gmra.mxu2 %vm326_vm1, %v3210_v24  ;;  %v1154_v24 = vld [vmem:[%s3027_s11 + $0xa3] sm:$0xff] }
  0xee   : > { %2696 = vmatmul.msk.bf16.gmra.mxu0 %vm326_vm1, %v1180_v29  ;;  %2679 = vmatmul.msk.bf16.gmra.mxu3 %vm326_vm1, %v3287_v36  ;;  %v1181_v21 = vpack.c.bf16 %v1155_v14, %v1154_v24  ;;  %v910_v29 = vld [vmem:[%s3027_s11 + $0xc2] sm:$0xff] }
  0xef   : > { %v235_v24 = vld [vmem:[%s3027_s11 + $0xa0] sm:$0xff]  ;;  %v236_v14 = vld [vmem:[%s3027_s11 + $0xa8] sm:$0xff] }
  0xf0   : > { %v762_v38 = vpop.f32.mrf.mxu2 }
  0xf1   : > { %v852_v46 = vadd.f32 %v762_v38, %v551_v37  ;;  %v552_v47 = vpop.f32.mrf.mxu1  ;;  %v1020_v52 = vpop.f32.mrf.mxu3 }
  0xf2   : > { %v553_v15 = vadd.f32 %v552_v47, %v3162_v57 }
  0xf3   : > { %v1260_v48 = vpop.f32.mrf.mxu0  ;;  %v1100_v50 = vadd.f32 %v1010_v45, %v852_v46 }
  0xf5   : > { %v3297_v61 = vadd.f32 %v1258_v32, %v1100_v50  ;;  %v3305_v32 = vpack.c.bf16 %v911_v30, %v910_v29  ;;  %v912_v29 = vld [vmem:[%s3027_s11 + $0xd2] sm:$0xff]  ;;  %v913_v30 = vld [vmem:[%s3027_s11 + $0xda] sm:$0xff] }
  0xf8   : > { %v764_v53 = vpop.f32.mrf.mxu2 }
  0xf9   : > { %v853_v19 = vadd.f32 %v764_v53, %v553_v15  ;;  %v555_v7 = vpop.f32.mrf.mxu1  ;;  %v1022_v45 = vpop.f32.mrf.mxu3  ;;  %v1156_v15 = vld [vmem:[%s3027_s11 + $0xb3] sm:$0xff] }
  0xfa   : > { %v556_v38 = vadd.f32 %v555_v7, %v3176_v5 }
  0xfb   : > { %v1263_v31 = vpop.f32.mrf.mxu0  ;;  %v1101_v37 = vadd.f32 %v1012_v0, %v853_v19 }
  0xfc   : > { %2640 = vmatmul.msk.bf16.gmra.mxu1 %vm326_vm1, %v260_v17  ;;  %v261_v17 = vpack.c.bf16 %v236_v14, %v235_v24 }
  0xfd   : > { %2659 = vmatmul.msk.bf16.gmra.mxu2 %vm326_vm1, %v3239_v41  ;;  %v3310_v57 = vadd.f32 %v1260_v48, %v1101_v37  ;;  %v1157_v48 = vld [vmem:[%s3027_s11 + $0xbb] sm:$0xff] }
  0xfe   : > { %2697 = vmatmul.msk.bf16.gmra.mxu0 %vm326_vm1, %v1181_v21  ;;  %2680 = vmatmul.msk.bf16.gmra.mxu3 %vm326_vm1, %v3305_v32  ;;  %v1182_v21 = vpack.c.bf16 %v1157_v48, %v1156_v15  ;;  %v237_v15 = vld [vmem:[%s3027_s11 + $0xb0] sm:$0xff]  ;;  %v238_v48 = vld [vmem:[%s3027_s11 + $0xb8] sm:$0xff] }
 0x100   : > { %v767_v46 = vpop.f32.mrf.mxu2 }
 0x101   : > { %v854_v0 = vadd.f32 %v767_v46, %v556_v38  ;;  %v557_v47 = vpop.f32.mrf.mxu1  ;;  %v1025_v60 = vpop.f32.mrf.mxu3 }
 0x102   : > { %v558_v53 = vadd.f32 %v557_v47, %v3191_v10 }
 0x103   : > { %v1265_v50 = vpop.f32.mrf.mxu0  ;;  %v1102_v59 = vadd.f32 %v1015_v13, %v854_v0 }
 0x105   : > { %v3317_v41 = vadd.f32 %v1263_v31, %v1102_v59  ;;  %v3325_v31 = vpack.c.bf16 %v913_v30, %v912_v29  ;;  %v914_v29 = vld [vmem:[%s3027_s11 + $0xe2] sm:$0xff]  ;;  %v915_v30 = vld [vmem:[%s3027_s11 + $0xea] sm:$0xff] }
 0x108   : > { %v769_v5 = vpop.f32.mrf.mxu2 }
 0x109   : > { %v855_v19 = vadd.f32 %v769_v5, %v558_v53  ;;  %v560_v7 = vpop.f32.mrf.mxu1  ;;  %v1027_v13 = vpop.f32.mrf.mxu3  ;;  %v1158_v53 = vld [vmem:[%s3027_s11 + $0xc3] sm:$0xff] }
 0x10a   : > { %v561_v46 = vadd.f32 %v560_v7, %v3205_v22 }
 0x10b   : > { %v1268_v37 = vpop.f32.mrf.mxu0  ;;  %v1103_v38 = vadd.f32 %v1017_v34, %v855_v19 }
 0x10c   : > { %2641 = vmatmul.msk.bf16.gmra.mxu1 %vm326_vm1, %v261_v17  ;;  %v262_v17 = vpack.c.bf16 %v238_v48, %v237_v15 }
 0x10d   : > { %2660 = vmatmul.msk.bf16.gmra.mxu2 %vm326_vm1, %v3265_v2  ;;  %v3330_v10 = vadd.f32 %v1265_v50, %v1103_v38  ;;  %v1159_v50 = vld [vmem:[%s3027_s11 + $0xcb] sm:$0xff] }
 0x10e   : > { %2698 = vmatmul.msk.bf16.gmra.mxu0 %vm326_vm1, %v1182_v21  ;;  %2681 = vmatmul.msk.bf16.gmra.mxu3 %vm326_vm1, %v3325_v31  ;;  %v1183_v21 = vpack.c.bf16 %v1159_v50, %v1158_v53  ;;  %v239_v53 = vld [vmem:[%s3027_s11 + $0xc0] sm:$0xff]  ;;  %v240_v50 = vld [vmem:[%s3027_s11 + $0xc8] sm:$0xff] }
 0x110   : > { %v772_v0 = vpop.f32.mrf.mxu2 }
 0x111   : > { %v856_v34 = vadd.f32 %v772_v0, %v561_v46  ;;  %v562_v47 = vpop.f32.mrf.mxu1  ;;  %v1030_v14 = vpop.f32.mrf.mxu3 }
 0x112   : > { %v563_v5 = vadd.f32 %v562_v47, %v3220_v27 }
 0x113   : > { %v1270_v59 = vpop.f32.mrf.mxu0  ;;  %v1104_v24 = vadd.f32 %v1020_v52, %v856_v34 }
 0x115   : > { %v3337_v2 = vadd.f32 %v1268_v37, %v1104_v24  ;;  %v3345_v37 = vpack.c.bf16 %v915_v30, %v914_v29  ;;  %v916_v29 = vld [vmem:[%s3027_s11 + $0xf2] sm:$0xff]  ;;  %v917_v30 = vld [vmem:[%s3027_s11 + $0xfa] sm:$0xff] }
 0x118   : > { %v774_v22 = vpop.f32.mrf.mxu2 }
 0x119   : > { %v857_v19 = vadd.f32 %v774_v22, %v563_v5  ;;  %v565_v7 = vpop.f32.mrf.mxu1  ;;  %v1032_v52 = vpop.f32.mrf.mxu3  ;;  %v1160_v5 = vld [vmem:[%s3027_s11 + $0xd3] sm:$0xff] }
 0x11a   : > { %v566_v0 = vadd.f32 %v565_v7, %v3234_v39 }
 0x11b   : > { %v1273_v38 = vpop.f32.mrf.mxu0  ;;  %v1105_v46 = vadd.f32 %v1022_v45, %v857_v19 }
 0x11c   : > { %2642 = vmatmul.msk.bf16.gmra.mxu1 %vm326_vm1, %v262_v17  ;;  %v263_v17 = vpack.c.bf16 %v240_v50, %v239_v53 }
 0x11d   : > { %2661 = vmatmul.msk.bf16.gmra.mxu2 %vm326_vm1, %v3287_v36  ;;  %v3350_v27 = vadd.f32 %v1270_v59, %v1105_v46  ;;  %v1161_v59 = vld [vmem:[%s3027_s11 + $0xdb] sm:$0xff] }
 0x11e   : > { %2699 = vmatmul.msk.bf16.gmra.mxu0 %vm326_vm1, %v1183_v21  ;;  %2682 = vmatmul.msk.bf16.gmra.mxu3 %vm326_vm1, %v3345_v37  ;;  %v1184_v21 = vpack.c.bf16 %v1161_v59, %v1160_v5  ;;  %v241_v5 = vld [vmem:[%s3027_s11 + $0xd0] sm:$0xff]  ;;  %v242_v59 = vld [vmem:[%s3027_s11 + $0xd8] sm:$0xff] }
 0x120   : > { %v777_v34 = vpop.f32.mrf.mxu2 }
 0x121   : > { %v858_v45 = vadd.f32 %v777_v34, %v566_v0  ;;  %v567_v47 = vpop.f32.mrf.mxu1  ;;  %v1035_v48 = vpop.f32.mrf.mxu3 }
 0x122   : > { %v568_v22 = vadd.f32 %v567_v47, %v3250_v44 }
 0x123   : > { %v1275_v24 = vpop.f32.mrf.mxu0  ;;  %v1106_v15 = vadd.f32 %v1025_v60, %v858_v45 }
 0x125   : > { %v3357_v36 = vadd.f32 %v1273_v38, %v1106_v15  ;;  %v3365_v38 = vpack.c.bf16 %v917_v30, %v916_v29  ;;  %v918_v29 = vld [vmem:[%s3027_s11 + $0x102] sm:$0xff]  ;;  %v919_v30 = vld [vmem:[%s3027_s11 + $0x10a] sm:$0xff] }
 0x128   : > { %v779_v39 = vpop.f32.mrf.mxu2 }
 0x129   : > { %v859_v19 = vadd.f32 %v779_v39, %v568_v22  ;;  %v570_v7 = vpop.f32.mrf.mxu1  ;;  %v1037_v60 = vpop.f32.mrf.mxu3  ;;  %v1162_v22 = vld [vmem:[%s3027_s11 + $0xe3] sm:$0xff] }
 0x12a   : > { %v571_v34 = vadd.f32 %v570_v7, %v3262_v62 }
 0x12b   : > { %v1278_v46 = vpop.f32.mrf.mxu0  ;;  %v1107_v0 = vadd.f32 %v1027_v13, %v859_v19 }
 0x12c   : > { %2643 = vmatmul.msk.bf16.gmra.mxu1 %vm326_vm1, %v263_v17  ;;  %v264_v17 = vpack.c.bf16 %v242_v59, %v241_v5 }
 0x12d   : > { %2662 = vmatmul.msk.bf16.gmra.mxu2 %vm326_vm1, %v3305_v32  ;;  %v3370_v44 = vadd.f32 %v1275_v24, %v1107_v0  ;;  %v1163_v24 = vld [vmem:[%s3027_s11 + $0xeb] sm:$0xff] }
 0x12e   : > { %2700 = vmatmul.msk.bf16.gmra.mxu0 %vm326_vm1, %v1184_v21  ;;  %2683 = vmatmul.msk.bf16.gmra.mxu3 %vm326_vm1, %v3365_v38  ;;  %v1185_v21 = vpack.c.bf16 %v1163_v24, %v1162_v22  ;;  %v243_v22 = vld [vmem:[%s3027_s11 + $0xe0] sm:$0xff]  ;;  %v244_v24 = vld [vmem:[%s3027_s11 + $0xe8] sm:$0xff] }
 0x130   : > { %v782_v45 = vpop.f32.mrf.mxu2 }
 0x131   : > { %v860_v13 = vadd.f32 %v782_v45, %v571_v34  ;;  %v572_v47 = vpop.f32.mrf.mxu1  ;;  %v1040_v50 = vpop.f32.mrf.mxu3 }
 0x132   : > { %v573_v39 = vadd.f32 %v572_v47, %v3276_v12 }
 0x133   : > { %v1280_v15 = vpop.f32.mrf.mxu0  ;;  %v1108_v53 = vadd.f32 %v1030_v14, %v860_v13 }
 0x135   : > { %v3377_v32 = vadd.f32 %v1278_v46, %v1108_v53  ;;  %v3385_v46 = vpack.c.bf16 %v919_v30, %v918_v29  ;;  %v920_v29 = vld [vmem:[%s3027_s11 + $0x112] sm:$0xff]  ;;  %v921_v30 = vld [vmem:[%s3027_s11 + $0x11a] sm:$0xff] }
 0x138   : > { %v784_v62 = vpop.f32.mrf.mxu2 }
 0x139   : > { %v861_v19 = vadd.f32 %v784_v62, %v573_v39  ;;  %v575_v7 = vpop.f32.mrf.mxu1  ;;  %v1042_v14 = vpop.f32.mrf.mxu3  ;;  %v1164_v39 = vld [vmem:[%s3027_s11 + $0xf3] sm:$0xff] }
 0x13a   : > { %v576_v45 = vadd.f32 %v575_v7, %v3145_v49 }
 0x13b   : > { %v1283_v0 = vpop.f32.mrf.mxu0  ;;  %v1109_v34 = vadd.f32 %v1032_v52, %v861_v19 }
 0x13c   : > { %2644 = vmatmul.msk.bf16.gmra.mxu1 %vm326_vm1, %v264_v17  ;;  %v265_v17 = vpack.c.bf16 %v244_v24, %v243_v22 }
 0x13d   : > { %2663 = vmatmul.msk.bf16.gmra.mxu2 %vm326_vm1, %v3325_v31  ;;  %v3390_v12 = vadd.f32 %v1280_v15, %v1109_v34  ;;  %v1165_v15 = vld [vmem:[%s3027_s11 + $0xfb] sm:$0xff] }
 0x13e   : > { %2701 = vmatmul.msk.bf16.gmra.mxu0 %vm326_vm1, %v1185_v21  ;;  %2684 = vmatmul.msk.bf16.gmra.mxu3 %vm326_vm1, %v3385_v46  ;;  %v1186_v21 = vpack.c.bf16 %v1165_v15, %v1164_v39  ;;  %v245_v39 = vld [vmem:[%s3027_s11 + $0xf0] sm:$0xff]  ;;  %v246_v15 = vld [vmem:[%s3027_s11 + $0xf8] sm:$0xff] }
 0x140   : > { %v787_v13 = vpop.f32.mrf.mxu2 }
 0x141   : > { %v862_v52 = vadd.f32 %v787_v13, %v576_v45  ;;  %v577_v47 = vpop.f32.mrf.mxu1  ;;  %v1045_v59 = vpop.f32.mrf.mxu3 }
 0x142   : > { %v578_v62 = vadd.f32 %v577_v47, %v3160_v56 }
 0x143   : > { %v1285_v53 = vpop.f32.mrf.mxu0  ;;  %v1110_v5 = vadd.f32 %v1035_v48, %v862_v52 }
 0x145   : > { %v3397_v31 = vadd.f32 %v1283_v0, %v1110_v5  ;;  %v3405_v0 = vpack.c.bf16 %v921_v30, %v920_v29  ;;  %v922_v29 = vld [vmem:[%s3027_s11 + $0x122] sm:$0xff]  ;;  %v923_v30 = vld [vmem:[%s3027_s11 + $0x12a] sm:$0xff] }
 0x148   : > { %v789_v49 = vpop.f32.mrf.mxu2 }
 0x149   : > { %v863_v19 = vadd.f32 %v789_v49, %v578_v62  ;;  %v580_v7 = vpop.f32.mrf.mxu1  ;;  %v1047_v48 = vpop.f32.mrf.mxu3  ;;  %v1166_v62 = vld [vmem:[%s3027_s11 + $0x103] sm:$0xff] }
 0x14a   : > { %v581_v13 = vadd.f32 %v580_v7, %v3172_v1 }
 0x14b   : > { %v1288_v34 = vpop.f32.mrf.mxu0  ;;  %v1111_v45 = vadd.f32 %v1037_v60, %v863_v19 }
 0x14c   : > { %2645 = vmatmul.msk.bf16.gmra.mxu1 %vm326_vm1, %v265_v17  ;;  %v266_v17 = vpack.c.bf16 %v246_v15, %v245_v39 }
 0x14d   : > { %2664 = vmatmul.msk.bf16.gmra.mxu2 %vm326_vm1, %v3345_v37  ;;  %v3410_v56 = vadd.f32 %v1285_v53, %v1111_v45  ;;  %v1167_v53 = vld [vmem:[%s3027_s11 + $0x10b] sm:$0xff] }
 0x14e   : > { %2702 = vmatmul.msk.bf16.gmra.mxu0 %vm326_vm1, %v1186_v21  ;;  %2685 = vmatmul.msk.bf16.gmra.mxu3 %vm326_vm1, %v3405_v0  ;;  %v1187_v21 = vpack.c.bf16 %v1167_v53, %v1166_v62  ;;  %v247_v62 = vld [vmem:[%s3027_s11 + $0x100] sm:$0xff]  ;;  %v248_v53 = vld [vmem:[%s3027_s11 + $0x108] sm:$0xff] }
 0x150   : > { %v792_v52 = vpop.f32.mrf.mxu2 }
 0x151   : > { %v864_v60 = vadd.f32 %v792_v52, %v581_v13  ;;  %v582_v47 = vpop.f32.mrf.mxu1  ;;  %v1050_v24 = vpop.f32.mrf.mxu3 }
 0x152   : > { %v583_v49 = vadd.f32 %v582_v47, %v3189_v9 }
 0x153   : > { %v1290_v5 = vpop.f32.mrf.mxu0  ;;  %v1112_v22 = vadd.f32 %v1040_v50, %v864_v60 }
 0x155   : > { %v3417_v37 = vadd.f32 %v1288_v34, %v1112_v22  ;;  %v941_v34 = vpack.c.bf16 %v923_v30, %v922_v29  ;;  %v1880_v29 = vld [vmem:[%s3027_s11 + $0x25] sm:$0xff]  ;;  %v1881_v30 = vld [vmem:[%s3027_s11 + $0x2d] sm:$0xff] }
 0x158   : > { %v794_v1 = vpop.f32.mrf.mxu2 }
 0x159   : > { %v865_v19 = vadd.f32 %v794_v1, %v583_v49  ;;  %v585_v7 = vpop.f32.mrf.mxu1  ;;  %v1052_v50 = vpop.f32.mrf.mxu3  ;;  %v1169_v1 = vld [vmem:[%s3027_s11 + $0x11b] sm:$0xff] }
 0x15a   : > { %v586_v52 = vadd.f32 %v585_v7, %v3201_v18  ;;  %v267_v18 = vpack.c.bf16 %v248_v53, %v247_v62  ;;  %v249_v53 = vld [vmem:[%s3027_s11 + $0x110] sm:$0xff] }
 0x15b   : > { %v1293_v45 = vpop.f32.mrf.mxu0  ;;  %v1113_v13 = vadd.f32 %v1042_v14, %v865_v19 }
 0x15c   : > { %2646 = vmatmul.msk.bf16.gmra.mxu1 %vm326_vm1, %v266_v17 }
 0x15d   : > { %2665 = vmatmul.msk.bf16.gmra.mxu2 %vm326_vm1, %v3365_v38  ;;  %v3428_v9 = vadd.f32 %v1290_v5, %v1113_v13  ;;  %v1168_v38 = vld [vmem:[%s3027_s11 + $0x113] sm:$0xff] }
 0x15e   : > { %2703 = vmatmul.msk.bf16.gmra.mxu0 %vm326_vm1, %v1187_v21  ;;  %2686 = vmatmul.msk.bf16.gmra.mxu3 %vm326_vm1, %v941_v34  ;;  %v1188_v21 = vpack.c.bf16 %v1169_v1, %v1168_v38  ;;  %v250_v38 = vld [vmem:[%s3027_s11 + $0x118] sm:$0xff] }
 0x160   : > { %v797_v60 = vpop.f32.mrf.mxu2 }
 0x161   : > { %v866_v14 = vadd.f32 %v797_v60, %v586_v52  ;;  %v587_v47 = vpop.f32.mrf.mxu1  ;;  %v1055_v15 = vpop.f32.mrf.mxu3 }
 0x162   : > { %v588_v5 = vadd.f32 %v587_v47, %v3218_v26 }
 0x163   : > { %v1295_v22 = vpop.f32.mrf.mxu0  ;;  %v1114_v39 = vadd.f32 %v1045_v59, %v866_v14 }
 0x165   : > { %v3434_v49 = vadd.f32 %v1293_v45, %v1114_v39  ;;  %v1916_v45 = vpack.c.bf16 %v1881_v30, %v1880_v29  ;;  %v1883_v29 = vld [vmem:[%s3027_s11 + $0x3d] sm:$0xff] }
 0x168   : > { %v799_v17 = vpop.f32.mrf.mxu2 }
 0x169   : > { %v867_v19 = vadd.f32 %v799_v17, %v588_v5  ;;  %v590_v7 = vpop.f32.mrf.mxu1  ;;  %v1057_v59 = vpop.f32.mrf.mxu3  ;;  %v1171_v5 = vld [vmem:[%s3027_s11 + $0x12b] sm:$0xff] }
 0x16a   : > { %v591_v52 = vadd.f32 %v590_v7, %v3230_v35  ;;  %v268_v35 = vpack.c.bf16 %v250_v38, %v249_v53  ;;  %v1384_v53 = vld [vmem:[%s3027_s11 + $0x14] sm:$0xff]  ;;  %v1632_v38 = vld [vmem:[%s3027_s11 + $0x24] sm:$0xff] }
 0x16b   : > { %v1298_v13 = vpop.f32.mrf.mxu0  ;;  %v1115_v34 = vadd.f32 %v1047_v48, %v867_v19 }
 0x16c   : > { %2647 = vmatmul.msk.bf16.gmra.mxu1 %vm326_vm1, %v267_v18 }
 0x16d   : > { %2666 = vmatmul.msk.bf16.gmra.mxu2 %vm326_vm1, %v3385_v46  ;;  %v3445_v26 = vadd.f32 %v1295_v22, %v1115_v34  ;;  %v1170_v46 = vld [vmem:[%s3027_s11 + $0x123] sm:$0xff] }
 0x16e   : > { %2704 = vmatmul.msk.bf16.gmra.mxu0 %vm326_vm1, %v1188_v21  ;;  %2745 = vmatmul.msk.bf16.vlgmr.msra.gmra.mxu3 %vm326_vm1, %v1916_v45  ;;  %v1189_v7 = vpack.c.bf16 %v1171_v5, %v1170_v46  ;;  %v1882_v21 = vld [vmem:[%s3027_s11 + $0x35] sm:$0xff]  ;;  %v1633_v5 = vld [vmem:[%s3027_s11 + $0x2c] sm:$0xff] }
 0x170   : > { %v802_v60 = vpop.f32.mrf.mxu2 }
 0x171   : > { %v868_v48 = vadd.f32 %v802_v60, %v591_v52  ;;  %v592_v14 = vpop.f32.mrf.mxu1  ;;  %v1060_v62 = vpop.f32.mrf.mxu3 }
 0x172   : > { %v593_v22 = vadd.f32 %v592_v14, %v3248_v43 }
 0x173   : > { %v1300_v47 = vpop.f32.mrf.mxu0  ;;  %v1116_v39 = vadd.f32 %v1050_v24, %v868_v48 }
 0x175   : > { %v3451_v1 = vadd.f32 %v1298_v13, %v1116_v39  ;;  %v1917_v13 = vpack.c.bf16 %v1883_v29, %v1882_v21  ;;  %v1885_v29 = vld [vmem:[%s3027_s11 + $0x4d] sm:$0xff] }
 0x178   : > { %v804_v17 = vpop.f32.mrf.mxu2 }
 0x179   : > { %v869_v18 = vadd.f32 %v804_v17, %v593_v22  ;;  %v595_v19 = vpop.f32.mrf.mxu1  ;;  %v1062_v24 = vpop.f32.mrf.mxu3  ;;  %v2129_v22 = vld [vmem:[%s3027_s11 + $0x2e] sm:$0xff] }
 0x17a   : > { %v596_v45 = vadd.f32 %v595_v19, %v3258_v54 }
 0x17b   : > { %v1303_v30 = vpop.f32.mrf.mxu0  ;;  %v1117_v34 = vadd.f32 %v1052_v50, %v869_v18 }
 0x17c   : > { %2648 = vmatmul.msk.bf16.gmra.mxu1 %vm326_vm1, %v268_v35 }
 0x17d   : > { %2667 = vmatmul.msk.bf16.gmra.mxu2 %vm326_vm1, %v3405_v0  ;;  %v3462_v43 = vadd.f32 %v1300_v47, %v1117_v34  ;;  %v1385_v0 = vld [vmem:[%s3027_s11 + $0x1c] sm:$0xff]  ;;  %v2128_v47 = vld [vmem:[%s3027_s11 + $0x26] sm:$0xff] }
 0x17e   : > { %2705 = vmatmul.msk.bf16.gmra.mxu0 %vm326_vm1, %v1189_v7  ;;  %2746 = vmatmul.msk.bf16.gmra.mxu3 %vm326_vm1, %v1917_v13  ;;  %v1420_v35 = vpack.c.bf16 %v1385_v0, %v1384_v53  ;;  %v1668_v7 = vpack.c.bf16 %v1633_v5, %v1632_v38  ;;  %v2164_v21 = vpack.c.bf16 %v2129_v22, %v2128_v47  ;;  %v1634_v38 = vld [vmem:[%s3027_s11 + $0x34] sm:$0xff]  ;;  %v1635_v47 = vld [vmem:[%s3027_s11 + $0x3c] sm:$0xff] }
 0x17f   : > { %v2130_v22 = vld [vmem:[%s3027_s11 + $0x36] sm:$0xff] }
 0x180   : > { %v807_v52 = vpop.f32.mrf.mxu2 }
 0x181   : > { %v870_v50 = vadd.f32 %v807_v52, %v596_v45  ;;  %v597_v60 = vpop.f32.mrf.mxu1  ;;  %v1065_v39 = vpop.f32.mrf.mxu3 }
 0x182   : > { %v598_v54 = vadd.f32 %v597_v60, %v3274_v4 }
 0x183   : > { %v1305_v48 = vpop.f32.mrf.mxu0  ;;  %v1118_v14 = vadd.f32 %v1055_v15, %v870_v50  ;;  %v1884_v15 = vld [vmem:[%s3027_s11 + $0x45] sm:$0xff] }
 0x185   : > { %v3469_v46 = vadd.f32 %v1303_v30, %v1118_v14  ;;  %v1918_v30 = vpack.c.bf16 %v1885_v29, %v1884_v15  ;;  %v1887_v15 = vld [vmem:[%s3027_s11 + $0x5d] sm:$0xff] }
 0x188   : > { %v809_v17 = vpop.f32.mrf.mxu2 }
 0x189   : > { %v871_v18 = vadd.f32 %v809_v17, %v598_v54  ;;  %v600_v19 = vpop.f32.mrf.mxu1  ;;  %v1067_v45 = vpop.f32.mrf.mxu3  ;;  %v2131_v54 = vld [vmem:[%s3027_s11 + $0x3e] sm:$0xff] }
 0x18a   : > { %v601_v52 = vadd.f32 %v600_v19, %v3156_v55  ;;  %v2165_v19 = vpack.c.bf16 %v2131_v54, %v2130_v22  ;;  %v2132_v22 = vld [vmem:[%s3027_s11 + $0x46] sm:$0xff]  ;;  %v2133_v54 = vld [vmem:[%s3027_s11 + $0x4e] sm:$0xff] }
 0x18b   : > { %v1308_v34 = vpop.f32.mrf.mxu0  ;;  %v1119_v13 = vadd.f32 %v1057_v59, %v871_v18  ;;  %v1669_v18 = vpack.c.bf16 %v1635_v47, %v1634_v38  ;;  %v1637_v47 = vld [vmem:[%s3027_s11 + $0x4c] sm:$0xff] }
 0x18c   : > { %2707 = vmatmul.msk.bf16.vlgmr.msra.gmra.mxu1 %vm326_vm1, %v1420_v35 }
 0x18d   : > { %2726 = vmatmul.msk.bf16.vlgmr.msra.gmra.mxu2 %vm326_vm1, %v1668_v7  ;;  %v3480_v4 = vadd.f32 %v1305_v48, %v1119_v13 }
 0x18e   : > { %2764 = vmatmul.msk.bf16.vlgmr.msra.gmra.mxu0 %vm326_vm1, %v2164_v21  ;;  %2747 = vmatmul.msk.bf16.gmra.mxu3 %vm326_vm1, %v1918_v30  ;;  %v1886_v21 = vld [vmem:[%s3027_s11 + $0x55] sm:$0xff] }
 0x190   : > { %v812_v50 = vpop.f32.mrf.mxu2 }
 0x191   : > { %v872_v60 = vadd.f32 %v812_v50, %v601_v52  ;;  %v602_v59 = vpop.f32.mrf.mxu1  ;;  %v1070_v0 = vpop.f32.mrf.mxu3 }
 0x192   : > { %v603_v48 = vadd.f32 %v602_v59, %v3170_v63 }
 0x193   : > { %v1310_v14 = vpop.f32.mrf.mxu0  ;;  %v1120_v53 = vadd.f32 %v1060_v62, %v872_v60 }
 0x195   : > { %v3485_v5 = vadd.f32 %v1308_v34, %v1120_v53  ;;  %v1919_v34 = vpack.c.bf16 %v1887_v15, %v1886_v21  ;;  %v1636_v53 = vld [vmem:[%s3027_s11 + $0x44] sm:$0xff]  ;;  %v1889_v21 = vld [vmem:[%s3027_s11 + $0x6d] sm:$0xff] }
 0x198   : > { %v814_v17 = vpop.f32.mrf.mxu2 }
 0x199   : > { %v873_v55 = vadd.f32 %v814_v17, %v603_v48  ;;  %v605_v35 = vpop.f32.mrf.mxu1  ;;  %v1072_v62 = vpop.f32.mrf.mxu3 }
 0x19a   : > { %v606_v30 = vadd.f32 %v605_v35, %v3185_v8  ;;  %v2166_v35 = vpack.c.bf16 %v2133_v54, %v2132_v22  ;;  %v2134_v22 = vld [vmem:[%s3027_s11 + $0x56] sm:$0xff]  ;;  %v2135_v54 = vld [vmem:[%s3027_s11 + $0x5e] sm:$0xff] }
 0x19b   : > { %v1313_v29 = vpop.f32.mrf.mxu0  ;;  %v1121_v13 = vadd.f32 %v1062_v24, %v873_v55  ;;  %v1670_v55 = vpack.c.bf16 %v1637_v47, %v1636_v53  ;;  %v1639_v47 = vld [vmem:[%s3027_s11 + $0x5c] sm:$0xff] }
 0x19c   : > { %2708 = vmatmul.msk.bf16.gmra.mxu1 %vm326_vm1, %v1668_v7 }
 0x19d   : > { %2727 = vmatmul.msk.bf16.gmra.mxu2 %vm326_vm1, %v1669_v18  ;;  %v3496_v63 = vadd.f32 %v1310_v14, %v1121_v13 }
 0x19e   : > { %2765 = vmatmul.msk.bf16.gmra.mxu0 %vm326_vm1, %v2165_v19  ;;  %2748 = vmatmul.msk.bf16.gmra.mxu3 %vm326_vm1, %v1919_v34  ;;  %v1888_v19 = vld [vmem:[%s3027_s11 + $0x65] sm:$0xff] }
 0x1a0   : > { %v817_v52 = vpop.f32.mrf.mxu2 }
 0x1a1   : > { %v874_v50 = vadd.f32 %v817_v52, %v606_v30  ;;  %v607_v24 = vpop.f32.mrf.mxu1  ;;  %v1075_v59 = vpop.f32.mrf.mxu3 }
 0x1a2   : > { %v608_v14 = vadd.f32 %v607_v24, %v3199_v16 }
 0x1a3   : > { %v1315_v60 = vpop.f32.mrf.mxu0  ;;  %v1122_v7 = vadd.f32 %v1065_v39, %v874_v50 }
 0x1a5   : > { %v3501_v38 = vadd.f32 %v1313_v29, %v1122_v7  ;;  %v1920_v29 = vpack.c.bf16 %v1889_v21, %v1888_v19  ;;  %v1638_v7 = vld [vmem:[%s3027_s11 + $0x54] sm:$0xff]  ;;  %v1891_v19 = vld [vmem:[%s3027_s11 + $0x7d] sm:$0xff] }
 0x1a8   : > { %v819_v48 = vpop.f32.mrf.mxu2 }
 0x1a9   : > { %v875_v8 = vadd.f32 %v819_v48, %v608_v14  ;;  %v610_v17 = vpop.f32.mrf.mxu1  ;;  %v1077_v39 = vpop.f32.mrf.mxu3 }
 0x1aa   : > { %v611_v34 = vadd.f32 %v610_v17, %v3214_v25  ;;  %v2167_v17 = vpack.c.bf16 %v2135_v54, %v2134_v22  ;;  %v2136_v22 = vld [vmem:[%s3027_s11 + $0x66] sm:$0xff]  ;;  %v2137_v54 = vld [vmem:[%s3027_s11 + $0x6e] sm:$0xff] }
 0x1ab   : > { %v1318_v15 = vpop.f32.mrf.mxu0  ;;  %v1123_v13 = vadd.f32 %v1067_v45, %v875_v8  ;;  %v1671_v8 = vpack.c.bf16 %v1639_v47, %v1638_v7  ;;  %v1641_v47 = vld [vmem:[%s3027_s11 + $0x6c] sm:$0xff] }
 0x1ac   : > { %2709 = vmatmul.msk.bf16.gmra.mxu1 %vm326_vm1, %v1669_v18 }
 0x1ad   : > { %2728 = vmatmul.msk.bf16.gmra.mxu2 %vm326_vm1, %v1670_v55  ;;  %v3512_v16 = vadd.f32 %v1315_v60, %v1123_v13 }
 0x1ae   : > { %2766 = vmatmul.msk.bf16.gmra.mxu0 %vm326_vm1, %v2166_v35  ;;  %2749 = vmatmul.msk.bf16.gmra.mxu3 %vm326_vm1, %v1920_v29  ;;  %v1890_v35 = vld [vmem:[%s3027_s11 + $0x75] sm:$0xff] }
 0x1b0   : > { %v822_v30 = vpop.f32.mrf.mxu2 }
 0x1b1   : > { %v876_v52 = vadd.f32 %v822_v30, %v611_v34  ;;  %v612_v45 = vpop.f32.mrf.mxu1  ;;  %v1080_v24 = vpop.f32.mrf.mxu3 }
 0x1b2   : > { %v613_v60 = vadd.f32 %v612_v45, %v3228_v33 }
 0x1b3   : > { %v1320_v50 = vpop.f32.mrf.mxu0  ;;  %v1124_v18 = vadd.f32 %v1070_v0, %v876_v52 }
 0x1b5   : > { %v3517_v53 = vadd.f32 %v1318_v15, %v1124_v18  ;;  %v1921_v15 = vpack.c.bf16 %v1891_v19, %v1890_v35  ;;  %v1640_v18 = vld [vmem:[%s3027_s11 + $0x64] sm:$0xff]  ;;  %v1893_v35 = vld [vmem:[%s3027_s11 + $0x8d] sm:$0xff] }
 0x1b8   : > { %v824_v14 = vpop.f32.mrf.mxu2 }
 0x1b9   : > { %v877_v25 = vadd.f32 %v824_v14, %v613_v60  ;;  %v615_v48 = vpop.f32.mrf.mxu1  ;;  %v1082_v0 = vpop.f32.mrf.mxu3 }
 0x1ba   : > { %v616_v29 = vadd.f32 %v615_v48, %v3244_v42  ;;  %v2168_v48 = vpack.c.bf16 %v2137_v54, %v2136_v22  ;;  %v2138_v22 = vld [vmem:[%s3027_s11 + $0x76] sm:$0xff]  ;;  %v2139_v54 = vld [vmem:[%s3027_s11 + $0x7e] sm:$0xff] }
 0x1bb   : > { %v1323_v21 = vpop.f32.mrf.mxu0  ;;  %v1125_v13 = vadd.f32 %v1072_v62, %v877_v25  ;;  %v1672_v25 = vpack.c.bf16 %v1641_v47, %v1640_v18  ;;  %v1643_v47 = vld [vmem:[%s3027_s11 + $0x7c] sm:$0xff] }
 0x1bc   : > { %2710 = vmatmul.msk.bf16.gmra.mxu1 %vm326_vm1, %v1670_v55 }
 0x1bd   : > { %2729 = vmatmul.msk.bf16.gmra.mxu2 %vm326_vm1, %v1671_v8  ;;  %v3528_v33 = vadd.f32 %v1320_v50, %v1125_v13 }
 0x1be   : > { %2767 = vmatmul.msk.bf16.gmra.mxu0 %vm326_vm1, %v2167_v17  ;;  %2750 = vmatmul.msk.bf16.gmra.mxu3 %vm326_vm1, %v1921_v15  ;;  %v1892_v17 = vld [vmem:[%s3027_s11 + $0x85] sm:$0xff] }
 0x1c0   : > { %v827_v34 = vpop.f32.mrf.mxu2 }
 0x1c1   : > { %v878_v30 = vadd.f32 %v827_v34, %v616_v29  ;;  %v617_v62 = vpop.f32.mrf.mxu1  ;;  %v1085_v45 = vpop.f32.mrf.mxu3 }
 0x1c2   : > { %v618_v50 = vadd.f32 %v617_v62, %v3256_v51 }
 0x1c3   : > { %v1325_v52 = vpop.f32.mrf.mxu0  ;;  %v1126_v55 = vadd.f32 %v1075_v59, %v878_v30 }
 0x1c5   : > { %v3533_v7 = vadd.f32 %v1323_v21, %v1126_v55  ;;  %v1922_v21 = vpack.c.bf16 %v1893_v35, %v1892_v17  ;;  %v1642_v55 = vld [vmem:[%s3027_s11 + $0x74] sm:$0xff]  ;;  %v1895_v17 = vld [vmem:[%s3027_s11 + $0x9d] sm:$0xff] }
 0x1c8   : > { %v829_v60 = vpop.f32.mrf.mxu2 }
 0x1c9   : > { %v879_v42 = vadd.f32 %v829_v60, %v618_v50  ;;  %v620_v14 = vpop.f32.mrf.mxu1  ;;  %v1087_v59 = vpop.f32.mrf.mxu3 }
 0x1ca   : > { %v621_v15 = vadd.f32 %v620_v14, %v3270_v3  ;;  %v2169_v14 = vpack.c.bf16 %v2139_v54, %v2138_v22  ;;  %v2140_v22 = vld [vmem:[%s3027_s11 + $0x86] sm:$0xff]  ;;  %v2141_v54 = vld [vmem:[%s3027_s11 + $0x8e] sm:$0xff] }
 0x1cb   : > { %v1328_v19 = vpop.f32.mrf.mxu0  ;;  %v1127_v13 = vadd.f32 %v1077_v39, %v879_v42  ;;  %v1673_v42 = vpack.c.bf16 %v1643_v47, %v1642_v55  ;;  %v1645_v47 = vld [vmem:[%s3027_s11 + $0x8c] sm:$0xff] }
 0x1cc   : > { %2711 = vmatmul.msk.bf16.gmra.mxu1 %vm326_vm1, %v1671_v8 }
 0x1cd   : > { %2730 = vmatmul.msk.bf16.gmra.mxu2 %vm326_vm1, %v1672_v25  ;;  %v3544_v51 = vadd.f32 %v1325_v52, %v1127_v13 }
 0x1ce   : > { %2768 = vmatmul.msk.bf16.gmra.mxu0 %vm326_vm1, %v2168_v48  ;;  %2751 = vmatmul.msk.bf16.gmra.mxu3 %vm326_vm1, %v1922_v21  ;;  %v1894_v48 = vld [vmem:[%s3027_s11 + $0x95] sm:$0xff] }
 0x1d0   : > { %v832_v29 = vpop.f32.mrf.mxu2 }
 0x1d1   : > { %v880_v34 = vadd.f32 %v832_v29, %v621_v15  ;;  %v622_v39 = vpop.f32.mrf.mxu1  ;;  %v1090_v62 = vpop.f32.mrf.mxu3 }
 0x1d2   : > { %v623_v52 = vadd.f32 %v622_v39, %v3282_v20 }
 0x1d3   : > { %v1330_v30 = vpop.f32.mrf.mxu0  ;;  %v1128_v8 = vadd.f32 %v1080_v24, %v880_v34 }
 0x1d5   : > { %v3549_v18 = vadd.f32 %v1328_v19, %v1128_v8  ;;  %v1923_v19 = vpack.c.bf16 %v1895_v17, %v1894_v48  ;;  %v1644_v8 = vld [vmem:[%s3027_s11 + $0x84] sm:$0xff]  ;;  %v1897_v48 = vld [vmem:[%s3027_s11 + $0xad] sm:$0xff] }
 0x1d8   : > { %v834_v50 = vpop.f32.mrf.mxu2 }
 0x1d9   : > { %v881_v3 = vadd.f32 %v834_v50, %v623_v52  ;;  %v625_v60 = vpop.f32.mrf.mxu1  ;;  %v1092_v24 = vpop.f32.mrf.mxu3 }
 0x1da   : > { %v626_v21 = vadd.f32 %v625_v60, %v3164_v58  ;;  %v2170_v60 = vpack.c.bf16 %v2141_v54, %v2140_v22  ;;  %v2142_v22 = vld [vmem:[%s3027_s11 + $0x96] sm:$0xff]  ;;  %v2143_v54 = vld [vmem:[%s3027_s11 + $0x9e] sm:$0xff] }
 0x1db   : > { %v1333_v35 = vpop.f32.mrf.mxu0  ;;  %v1129_v13 = vadd.f32 %v1082_v0, %v881_v3  ;;  %v1674_v3 = vpack.c.bf16 %v1645_v47, %v1644_v8  ;;  %v1647_v47 = vld [vmem:[%s3027_s11 + $0x9c] sm:$0xff] }
 0x1dc   : > { %2712 = vmatmul.msk.bf16.gmra.mxu1 %vm326_vm1, %v1672_v25 }
 0x1dd   : > { %2731 = vmatmul.msk.bf16.gmra.mxu2 %vm326_vm1, %v1673_v42  ;;  %v3560_v20 = vadd.f32 %v1330_v30, %v1129_v13 }
 0x1de   : > { %2769 = vmatmul.msk.bf16.gmra.mxu0 %vm326_vm1, %v2169_v14  ;;  %2752 = vmatmul.msk.bf16.gmra.mxu3 %vm326_vm1, %v1923_v19  ;;  %v1896_v14 = vld [vmem:[%s3027_s11 + $0xa5] sm:$0xff] }
 0x1e0   : > { %v837_v15 = vpop.f32.mrf.mxu2 }
 0x1e1   : > { %v882_v29 = vadd.f32 %v837_v15, %v626_v21  ;;  %v627_v0 = vpop.f32.mrf.mxu1  ;;  %v1095_v39 = vpop.f32.mrf.mxu3 }
 0x1e2   : > { %v628_v30 = vadd.f32 %v627_v0, %v3178_v6 }
 0x1e3   : > { %v1335_v34 = vpop.f32.mrf.mxu0  ;;  %v1130_v25 = vadd.f32 %v1085_v45, %v882_v29 }
 0x1e5   : > { %v3565_v55 = vadd.f32 %v1333_v35, %v1130_v25  ;;  %v1924_v35 = vpack.c.bf16 %v1897_v48, %v1896_v14  ;;  %v1646_v25 = vld [vmem:[%s3027_s11 + $0x94] sm:$0xff]  ;;  %v1899_v14 = vld [vmem:[%s3027_s11 + $0xbd] sm:$0xff] }
 0x1e8   : > { %v839_v52 = vpop.f32.mrf.mxu2 }
 0x1e9   : > { %v883_v58 = vadd.f32 %v839_v52, %v628_v30  ;;  %v630_v50 = vpop.f32.mrf.mxu1  ;;  %v1097_v45 = vpop.f32.mrf.mxu3 }
 0x1ea   : > { %v631_v19 = vadd.f32 %v630_v50, %v3193_v11  ;;  %v2171_v50 = vpack.c.bf16 %v2143_v54, %v2142_v22  ;;  %v2144_v22 = vld [vmem:[%s3027_s11 + $0xa6] sm:$0xff] }
 0x1eb   : > { %v1338_v17 = vpop.f32.mrf.mxu0  ;;  %v1131_v13 = vadd.f32 %v1087_v59, %v883_v58  ;;  %v1675_v58 = vpack.c.bf16 %v1647_v47, %v1646_v25  ;;  %v1649_v47 = vld [vmem:[%s3027_s11 + $0xac] sm:$0xff] }
 0x1ec   : > { %2713 = vmatmul.msk.bf16.gmra.mxu1 %vm326_vm1, %v1673_v42 }
 0x1ed   : > { %2732 = vmatmul.msk.bf16.gmra.mxu2 %vm326_vm1, %v1674_v3  ;;  %v3576_v6 = vadd.f32 %v1335_v34, %v1131_v13 }
 0x1ee   : > { %2770 = vmatmul.msk.bf16.gmra.mxu0 %vm326_vm1, %v2170_v60  ;;  %2753 = vmatmul.msk.bf16.gmra.mxu3 %vm326_vm1, %v1924_v35  ;;  %v1898_v60 = vld [vmem:[%s3027_s11 + $0xb5] sm:$0xff] }
 0x1f0   : > { %v842_v21 = vpop.f32.mrf.mxu2 }
 0x1f1   : > { %v884_v15 = vadd.f32 %v842_v21, %v631_v19  ;;  %v632_v59 = vpop.f32.mrf.mxu1  ;;  %v2002_v0 = vpop.f32.mrf.mxu3 }
 0x1f2   : > { %v633_v34 = vadd.f32 %v632_v59, %v3207_v23 }
 0x1f3   : > { %v1340_v29 = vpop.f32.mrf.mxu0  ;;  %v1132_v42 = vadd.f32 %v1090_v62, %v884_v15 }
 0x1f5   : > { %v3581_v8 = vadd.f32 %v1338_v17, %v1132_v42  ;;  %v1925_v17 = vpack.c.bf16 %v1899_v14, %v1898_v60  ;;  %v1648_v42 = vld [vmem:[%s3027_s11 + $0xa4] sm:$0xff]  ;;  %v1901_v60 = vld [vmem:[%s3027_s11 + $0xcd] sm:$0xff] }
 0x1f8   : > { %v844_v30 = vpop.f32.mrf.mxu2 }
 0x1f9   : > { %v885_v11 = vadd.f32 %v844_v30, %v633_v34  ;;  %v635_v52 = vpop.f32.mrf.mxu1  ;;  %v3589_v62 = vpop.f32.mrf.mxu3 }
 0x1fa   : > { %v636_v35 = vadd.f32 %v635_v52, %v3222_v28 }
 0x1fb   : > { %v1343_v48 = vpop.f32.mrf.mxu0  ;;  %v1133_v13 = vadd.f32 %v1092_v24, %v885_v11  ;;  %v1676_v11 = vpack.c.bf16 %v1649_v47, %v1648_v42  ;;  %v1651_v42 = vld [vmem:[%s3027_s11 + $0xbc] sm:$0xff] }
 0x1fc   : > { %2714 = vmatmul.msk.bf16.gmra.mxu1 %vm326_vm1, %v1674_v3  ;;  %v2146_v47 = vld [vmem:[%s3027_s11 + $0xb6] sm:$0xff] }
 0x1fd   : > { %2733 = vmatmul.msk.bf16.gmra.mxu2 %vm326_vm1, %v1675_v58  ;;  %v3594_v23 = vadd.f32 %v1340_v29, %v1133_v13  ;;  %v2145_v29 = vld [vmem:[%s3027_s11 + $0xae] sm:$0xff] }
 0x1fe   : > { %2771 = vmatmul.msk.bf16.gmra.mxu0 %vm326_vm1, %v2171_v50  ;;  %2754 = vmatmul.msk.bf16.gmra.mxu3 %vm326_vm1, %v1925_v17  ;;  %v2172_v52 = vpack.c.bf16 %v2145_v29, %v2144_v22  ;;  %v1900_v50 = vld [vmem:[%s3027_s11 + $0xc5] sm:$0xff] }
 0x1ff   : > { %v2147_v22 = vld [vmem:[%s3027_s11 + $0xbe] sm:$0xff] }
 0x200   : > { %v847_v19 = vpop.f32.mrf.mxu2 }
 0x201   : > { %v886_v24 = vadd.f32 %v847_v19, %v636_v35  ;;  %v637_v21 = vpop.f32.mrf.mxu1  ;;  %v3598_v59 = vpop.f32.mrf.mxu3 }
 0x202   : > { %v638_v54 = vadd.f32 %v637_v21, %v3236_v40  ;;  %v3622_v21 = vld [vmem:[%s3905_s2] ss:$0 sm:$0xff] }
 0x203   : > { %v1345_v15 = vpop.f32.mrf.mxu0  ;;  %v1134_v3 = vadd.f32 %v1095_v39, %v886_v24 }
 0x205   : > { %v3601_v25 = vadd.f32 %v1343_v48, %v1134_v3  ;;  %v1926_v48 = vpack.c.bf16 %v1901_v60, %v1900_v50  ;;  %v2173_v50 = vpack.c.bf16 %v2147_v22, %v2146_v47  ;;  %v1902_v60 = vld [vmem:[%s3027_s11 + $0xd5] sm:$0xff]  ;;  %v1652_v22 = vld [vmem:[%s3027_s11 + $0xc4] sm:$0xff] }
 0x208   : > { %v849_v28 = vpop.f32.mrf.mxu2 }
 0x209   : > { %v887_v34 = vadd.f32 %v849_v28, %v638_v54  ;;  %v1506_v30 = vpop.f32.mrf.mxu1  ;;  %v3609_v13 = vpop.f32.mrf.mxu3 }
 0x20a   : > { %v1596_v17 = vadd.f32 %v1506_v30, %v3297_v61 }
 0x20b   : > { %v2250_v14 = vpop.f32.mrf.mxu0  ;;  %v1135_v39 = vadd.f32 %v1097_v45, %v887_v34 }
 0x20c   : > { %2715 = vmatmul.msk.bf16.gmra.mxu1 %vm326_vm1, %v1675_v58 }
 0x20d   : > { %2734 = vmatmul.msk.bf16.gmra.mxu2 %vm326_vm1, %v1676_v11  ;;  %v3614_v40 = vadd.f32 %v1345_v15, %v1135_v39  ;;  %v1650_v15 = vld [vmem:[%s3027_s11 + $0xb4] sm:$0xff]  ;;  %v1903_v39 = vld [vmem:[%s3027_s11 + $0xdd] sm:$0xff] }
 0x20e   : > { %2772 = vmatmul.msk.bf16.gmra.mxu0 %vm326_vm1, %v2172_v52  ;;  %2755 = vmatmul.msk.bf16.gmra.mxu3 %vm326_vm1, %v1926_v48  ;;  %v1677_v52 = vpack.c.bf16 %v1651_v42, %v1650_v15 }
 0x210   : > { %v1754_v35 = vpop.f32.mrf.mxu2 }
 0x211   : > { %v1844_v45 = vadd.f32 %v1754_v35, %v1596_v17  ;;  %v1508_v19 = vpop.f32.mrf.mxu1  ;;  %v3624_v3 = vpop.f32.mrf.mxu3 }
 0x213   : > { %v2252_v58 = vpop.f32.mrf.mxu0  ;;  %v2092_v24 = vadd.f32 %v2002_v0, %v1844_v45  ;;  %v1597_v0 = vadd.f32 %v1508_v19, %v3310_v57  ;;  %v1927_v57 = vpack.c.bf16 %v1903_v39, %v1902_v60 }
 0x215   : > { %v2340_v61 = vadd.f32 %v2250_v14, %v2092_v24 }
 0x217   : > { %v2380_v29 = vadd.f32 %v3622_v21, %v2340_v61 }
 0x218   : > { %v1756_v54 = vpop.f32.mrf.mxu2 }
 0x219   : > { %v2416_v28 = vmax.f32 %v2380_v29, 0.0  ;;  %v1845_v34 = vadd.f32 %v1756_v54, %v1597_v0  ;;  %v1511_v30 = vpop.f32.mrf.mxu1  ;;  %v3640_v17 = vpop.f32.mrf.mxu3  ;;  %v1653_v29 = vld [vmem:[%s3027_s11 + $0xcc] sm:$0xff] }
 0x21a   : > { %v1598_v19 = vadd.f32 %v1511_v30, %v3317_v41  ;;  %v2148_v0 = vld [vmem:[%s3027_s11 + $0xc6] sm:$0xff]  ;;  %v2149_v41 = vld [vmem:[%s3027_s11 + $0xce] sm:$0xff]  ;;  %v1678_v39 = vpack.c.bf16 %v1653_v29, %v1652_v22 }
 0x21b   : > { %v2255_v48 = vpop.f32.mrf.mxu0  ;;  %2452 = vst [vmem:[%s3636_s9] sm:$0xff] %v2416_v28  ;;  %v2093_v14 = vadd.f32 %v3589_v62, %v1845_v34  ;;  %v1654_v29 = vld [vmem:[%s3027_s11 + $0xd4] sm:$0xff] }
 0x21c   : > { %2716 = vmatmul.msk.bf16.gmra.mxu1 %vm326_vm1, %v1676_v11 }
 0x21d   : > { %v2341_v35 = vadd.f32 %v2252_v58, %v2093_v14  ;;  %2735 = vmatmul.msk.bf16.gmra.mxu2 %vm326_vm1, %v1677_v52  ;;  %v2174_v14 = vpack.c.bf16 %v2149_v41, %v2148_v0  ;;  %v1655_v0 = vld [vmem:[%s3027_s11 + $0xdc] sm:$0xff] }
 0x21e   : > { %2773 = vmatmul.msk.bf16.gmra.mxu0 %vm326_vm1, %v2173_v50  ;;  %2756 = vmatmul.msk.bf16.gmra.mxu3 %vm326_vm1, %v1927_v57  ;;  %v1905_v57 = vld [vmem:[%s3027_s11 + $0xed] sm:$0xff]  ;;  %v2150_v41 = vld [vmem:[%s3027_s11 + $0xd6] sm:$0xff] }
 0x21f   : > { %v2381_v45 = vadd.f32 %v3622_v21, %v2341_v35 }
 0x220   : > { %v1759_v24 = vpop.f32.mrf.mxu2 }
 0x221   : > { %v2417_v62 = vmax.f32 %v2381_v45, 0.0  ;;  %v1846_v61 = vadd.f32 %v1759_v24, %v1598_v19  ;;  %v1513_v11 = vpop.f32.mrf.mxu1  ;;  %v3650_v42 = vpop.f32.mrf.mxu3 }
 0x222   : > { %v1599_v28 = vadd.f32 %v1513_v11, %v3330_v10 }
 0x223   : > { %v2257_v15 = vpop.f32.mrf.mxu0  ;;  %2453 = vst [vmem:[%s3636_s9 + $0x8] sm:$0xff] %v2417_v62  ;;  %v2094_v58 = vadd.f32 %v3598_v59, %v1846_v61  ;;  %v1904_v59 = vld [vmem:[%s3027_s11 + $0xe5] sm:$0xff] }
 0x224   : > { %v1928_v19 = vpack.c.bf16 %v1905_v57, %v1904_v59  ;;  %v1907_v57 = vld [vmem:[%s3027_s11 + $0xfd] sm:$0xff] }
 0x225   : > { %v2342_v47 = vadd.f32 %v2255_v48, %v2094_v58 }
 0x227   : > { %v2382_v54 = vadd.f32 %v3622_v21, %v2342_v47 }
 0x228   : > { %v1761_v34 = vpop.f32.mrf.mxu2 }
 0x229   : > { %v2418_v30 = vmax.f32 %v2382_v54, 0.0  ;;  %v1847_v50 = vadd.f32 %v1761_v34, %v1599_v28  ;;  %v1516_v60 = vpop.f32.mrf.mxu1  ;;  %v3662_v45 = vpop.f32.mrf.mxu3 }
 0x22a   : > { %v1600_v62 = vadd.f32 %v1516_v60, %v3337_v2  ;;  %v2151_v2 = vld [vmem:[%s3027_s11 + $0xde] sm:$0xff] }
 0x22b   : > { %v2260_v35 = vpop.f32.mrf.mxu0  ;;  %2454 = vst [vmem:[%s3636_s9 + $0x10] sm:$0xff] %v2418_v30  ;;  %v2095_v48 = vadd.f32 %v3609_v13, %v1847_v50  ;;  %v2175_v59 = vpack.c.bf16 %v2151_v2, %v2150_v41 }
 0x22c   : > { %2717 = vmatmul.msk.bf16.gmra.mxu1 %vm326_vm1, %v1677_v52 }
 0x22d   : > { %v2343_v10 = vadd.f32 %v2257_v15, %v2095_v48  ;;  %2736 = vmatmul.msk.bf16.gmra.mxu2 %vm326_vm1, %v1678_v39 }
 0x22e   : > { %2774 = vmatmul.msk.bf16.gmra.mxu0 %vm326_vm1, %v2174_v14  ;;  %2757 = vmatmul.msk.bf16.gmra.mxu3 %vm326_vm1, %v1928_v19  ;;  %v1679_v14 = vpack.c.bf16 %v1655_v0, %v1654_v29  ;;  %v1657_v29 = vld [vmem:[%s3027_s11 + $0xec] sm:$0xff] }
 0x22f   : > { %v2383_v24 = vadd.f32 %v3622_v21, %v2343_v10  ;;  %v2152_v0 = vld [vmem:[%s3027_s11 + $0xe6] sm:$0xff] }
 0x230   : > { %v1764_v61 = vpop.f32.mrf.mxu2 }
 0x231   : > { %v2419_v13 = vmax.f32 %v2383_v24, 0.0  ;;  %v1848_v11 = vadd.f32 %v1764_v61, %v1600_v62  ;;  %v1518_v52 = vpop.f32.mrf.mxu1  ;;  %v3672_v47 = vpop.f32.mrf.mxu3 }
 0x232   : > { %v1601_v28 = vadd.f32 %v1518_v52, %v3350_v27 }
 0x233   : > { %v2262_v58 = vpop.f32.mrf.mxu0  ;;  %2455 = vst [vmem:[%s3636_s9 + $0x18] sm:$0xff] %v2419_v13  ;;  %v2096_v15 = vadd.f32 %v3624_v3, %v1848_v11  ;;  %v1906_v3 = vld [vmem:[%s3027_s11 + $0xf5] sm:$0xff] }
 0x234   : > { %v1929_v10 = vpack.c.bf16 %v1907_v57, %v1906_v3 }
 0x235   : > { %v2344_v22 = vadd.f32 %v2260_v35, %v2096_v15 }
 0x237   : > { %v2384_v54 = vadd.f32 %v3622_v21, %v2344_v22  ;;  %v1656_v22 = vld [vmem:[%s3027_s11 + $0xe4] sm:$0xff] }
 0x238   : > { %v1766_v34 = vpop.f32.mrf.mxu2 }
 0x239   : > { %v2420_v30 = vmax.f32 %v2384_v54, 0.0  ;;  %v1849_v50 = vadd.f32 %v1766_v34, %v1601_v28  ;;  %v1521_v60 = vpop.f32.mrf.mxu1  ;;  %v3684_v19 = vpop.f32.mrf.mxu3 }
 0x23a   : > { %v1602_v62 = vadd.f32 %v1521_v60, %v3357_v36  ;;  %v2153_v36 = vld [vmem:[%s3027_s11 + $0xee] sm:$0xff] }
 0x23b   : > { %v2265_v48 = vpop.f32.mrf.mxu0  ;;  %2456 = vst [vmem:[%s3636_s9 + $0x20] sm:$0xff] %v2420_v30  ;;  %v2097_v35 = vadd.f32 %v3640_v17, %v1849_v50  ;;  %v1680_v50 = vpack.c.bf16 %v1657_v29, %v1656_v22  ;;  %v2176_v60 = vpack.c.bf16 %v2153_v36, %v2152_v0 }
 0x23c   : > { %2718 = vmatmul.msk.bf16.gmra.mxu1 %vm326_vm1, %v1678_v39 }
 0x23d   : > { %v2345_v27 = vadd.f32 %v2262_v58, %v2097_v35  ;;  %2737 = vmatmul.msk.bf16.gmra.mxu2 %vm326_vm1, %v1679_v14 }
 0x23e   : > { %2775 = vmatmul.msk.bf16.gmra.mxu0 %vm326_vm1, %v2175_v59  ;;  %2758 = vmatmul.msk.bf16.gmra.mxu3 %vm326_vm1, %v1929_v10  ;;  %v1909_v59 = vld [vmem:[%s3027_s11 + $0x10d] sm:$0xff] }
 0x23f   : > { %v2385_v24 = vadd.f32 %v3622_v21, %v2345_v27 }
 0x240   : > { %v1769_v61 = vpop.f32.mrf.mxu2 }
 0x241   : > { %v2421_v17 = vmax.f32 %v2385_v24, 0.0  ;;  %v1850_v13 = vadd.f32 %v1769_v61, %v1602_v62  ;;  %v1523_v39 = vpop.f32.mrf.mxu1  ;;  %v3694_v58 = vpop.f32.mrf.mxu3 }
 0x242   : > { %v1603_v2 = vadd.f32 %v1523_v39, %v3370_v44 }
 0x243   : > { %v2267_v11 = vpop.f32.mrf.mxu0  ;;  %2457 = vst [vmem:[%s3636_s9 + $0x28] sm:$0xff] %v2421_v17  ;;  %v2098_v52 = vadd.f32 %v3650_v42, %v1850_v13  ;;  %v1908_v42 = vld [vmem:[%s3027_s11 + $0x105] sm:$0xff] }
 0x244   : > { %v1930_v35 = vpack.c.bf16 %v1909_v59, %v1908_v42 }
 0x245   : > { %v2346_v15 = vadd.f32 %v2265_v48, %v2098_v52  ;;  %v1659_v52 = vld [vmem:[%s3027_s11 + $0xfc] sm:$0xff] }
 0x247   : > { %v2386_v41 = vadd.f32 %v3622_v21, %v2346_v15  ;;  %v2154_v15 = vld [vmem:[%s3027_s11 + $0xf6] sm:$0xff] }
 0x248   : > { %v1771_v54 = vpop.f32.mrf.mxu2 }
 0x249   : > { %v2422_v28 = vmax.f32 %v2386_v41, 0.0  ;;  %v1851_v34 = vadd.f32 %v1771_v54, %v1603_v2  ;;  %v1526_v30 = vpop.f32.mrf.mxu1  ;;  %v3706_v48 = vpop.f32.mrf.mxu3 }
 0x24a   : > { %v1604_v27 = vadd.f32 %v1526_v30, %v3377_v32  ;;  %v2155_v32 = vld [vmem:[%s3027_s11 + $0xfe] sm:$0xff] }
 0x24b   : > { %v2270_v3 = vpop.f32.mrf.mxu0  ;;  %2458 = vst [vmem:[%s3636_s9 + $0x30] sm:$0xff] %v2422_v28  ;;  %v2099_v57 = vadd.f32 %v3662_v45, %v1851_v34  ;;  %v2177_v28 = vpack.c.bf16 %v2155_v32, %v2154_v15  ;;  %v1911_v34 = vld [vmem:[%s3027_s11 + $0x11d] sm:$0xff] }
 0x24c   : > { %2719 = vmatmul.msk.bf16.gmra.mxu1 %vm326_vm1, %v1679_v14 }
 0x24d   : > { %v2347_v44 = vadd.f32 %v2267_v11, %v2099_v57  ;;  %2738 = vmatmul.msk.bf16.gmra.mxu2 %vm326_vm1, %v1680_v50  ;;  %v1658_v11 = vld [vmem:[%s3027_s11 + $0xf4] sm:$0xff] }
 0x24e   : > { %2776 = vmatmul.msk.bf16.gmra.mxu0 %vm326_vm1, %v2176_v60  ;;  %2759 = vmatmul.msk.bf16.gmra.mxu3 %vm326_vm1, %v1930_v35  ;;  %v1681_v54 = vpack.c.bf16 %v1659_v52, %v1658_v11 }
 0x24f   : > { %v2387_v10 = vadd.f32 %v3622_v21, %v2347_v44 }
 0x250   : > { %v1774_v24 = vpop.f32.mrf.mxu2 }
 0x251   : > { %v2423_v45 = vmax.f32 %v2387_v10, 0.0  ;;  %v1852_v62 = vadd.f32 %v1774_v24, %v1604_v27  ;;  %v1528_v14 = vpop.f32.mrf.mxu1  ;;  %v3716_v13 = vpop.f32.mrf.mxu3 }
 0x252   : > { %v1605_v29 = vadd.f32 %v1528_v14, %v3390_v12  ;;  %v1661_v14 = vld [vmem:[%s3027_s11 + $0x10c] sm:$0xff] }
 0x253   : > { %v2272_v61 = vpop.f32.mrf.mxu0  ;;  %2459 = vst [vmem:[%s3636_s9 + $0x38] sm:$0xff] %v2423_v45  ;;  %v2100_v17 = vadd.f32 %v3672_v47, %v1852_v62  ;;  %v1910_v47 = vld [vmem:[%s3027_s11 + $0x115] sm:$0xff]  ;;  %v1660_v62 = vld [vmem:[%s3027_s11 + $0x104] sm:$0xff] }
 0x254   : > { %v1931_v59 = vpack.c.bf16 %v1911_v34, %v1910_v47 }
 0x255   : > { %v2348_v39 = vadd.f32 %v2270_v3, %v2100_v17 }
 0x257   : > { %v2388_v22 = vadd.f32 %v3622_v21, %v2348_v39 }
 0x258   : > { %v1776_v0 = vpop.f32.mrf.mxu2 }
 0x259   : > { %v2424_v36 = vmax.f32 %v2388_v22, 0.0  ;;  %v1853_v41 = vadd.f32 %v1776_v0, %v1605_v29  ;;  %v1531_v2 = vpop.f32.mrf.mxu1  ;;  %v3728_v42 = vpop.f32.mrf.mxu3  ;;  %v1682_v22 = vpack.c.bf16 %v1661_v14, %v1660_v62  ;;  %v1913_v0 = vld [vmem:[%s3027_s11 + $0x12d] sm:$0xff] }
 0x25a   : > { %v1606_v57 = vadd.f32 %v1531_v2, %v3397_v31  ;;  %v2157_v31 = vld [vmem:[%s3027_s11 + $0x10e] sm:$0xff] }
 0x25b   : > { %v2275_v30 = vpop.f32.mrf.mxu0  ;;  %2460 = vst [vmem:[%s3636_s9 + $0x40] sm:$0xff] %v2424_v36  ;;  %v2101_v60 = vadd.f32 %v3684_v19, %v1853_v41 }
 0x25c   : > { %2720 = vmatmul.msk.bf16.gmra.mxu1 %vm326_vm1, %v1680_v50 }
 0x25d   : > { %v2349_v12 = vadd.f32 %v2272_v61, %v2101_v60  ;;  %2739 = vmatmul.msk.bf16.gmra.mxu2 %vm326_vm1, %v1681_v54  ;;  %v2156_v61 = vld [vmem:[%s3027_s11 + $0x106] sm:$0xff] }
 0x25e   : > { %2777 = vmatmul.msk.bf16.gmra.mxu0 %vm326_vm1, %v2177_v28  ;;  %2760 = vmatmul.msk.bf16.gmra.mxu3 %vm326_vm1, %v1931_v59  ;;  %v2178_v29 = vpack.c.bf16 %v2157_v31, %v2156_v61 }
 0x25f   : > { %v2389_v3 = vadd.f32 %v3622_v21, %v2349_v12 }
 0x260   : > { %v1779_v35 = vpop.f32.mrf.mxu2 }
 0x261   : > { %v2425_v19 = vmax.f32 %v2389_v3, 0.0  ;;  %v1854_v44 = vadd.f32 %v1779_v35, %v1606_v57  ;;  %v1533_v50 = vpop.f32.mrf.mxu1  ;;  %v3738_v24 = vpop.f32.mrf.mxu3  ;;  %v1662_v35 = vld [vmem:[%s3027_s11 + $0x114] sm:$0xff] }
 0x262   : > { %v1607_v39 = vadd.f32 %v1533_v50, %v3410_v56 }
 0x263   : > { %v2277_v10 = vpop.f32.mrf.mxu0  ;;  %2461 = vst [vmem:[%s3636_s9 + $0x48] sm:$0xff] %v2425_v19  ;;  %v2102_v27 = vadd.f32 %v3694_v58, %v1854_v44  ;;  %v1912_v58 = vld [vmem:[%s3027_s11 + $0x125] sm:$0xff]  ;;  %v1663_v19 = vld [vmem:[%s3027_s11 + $0x11c] sm:$0xff] }
 0x264   : > { %v1932_v28 = vpack.c.bf16 %v1913_v0, %v1912_v58  ;;  %v2158_v44 = vld [vmem:[%s3027_s11 + $0x116] sm:$0xff]  ;;  %v1683_v61 = vpack.c.bf16 %v1663_v19, %v1662_v35 }
 0x265   : > { %v2350_v45 = vadd.f32 %v2275_v30, %v2102_v27 }
 0x267   : > { %v2390_v17 = vadd.f32 %v3622_v21, %v2350_v45 }
 0x268   : > { %v1781_v11 = vpop.f32.mrf.mxu2 }
 0x269   : > { %v2426_v52 = vmax.f32 %v2390_v17, 0.0  ;;  %v1855_v15 = vadd.f32 %v1781_v11, %v1607_v39  ;;  %v1536_v32 = vpop.f32.mrf.mxu1  ;;  %v3750_v2 = vpop.f32.mrf.mxu3  ;;  %v1915_v17 = vld [vmem:[%s3027_s11 + $0x13d] sm:$0xff] }
 0x26a   : > { %v1608_v34 = vadd.f32 %v1536_v32, %v3417_v37  ;;  %v2159_v37 = vld [vmem:[%s3027_s11 + $0x11e] sm:$0xff] }
 0x26b   : > { %v2280_v36 = vpop.f32.mrf.mxu0  ;;  %2462 = vst [vmem:[%s3636_s9 + $0x50] sm:$0xff] %v2426_v52  ;;  %v2103_v41 = vadd.f32 %v3706_v48, %v1855_v15  ;;  %v2179_v31 = vpack.c.bf16 %v2159_v37, %v2158_v44 }
 0x26c   : > { %2721 = vmatmul.msk.bf16.gmra.mxu1 %vm326_vm1, %v1681_v54 }
 0x26d   : > { %v2351_v56 = vadd.f32 %v2277_v10, %v2103_v41  ;;  %2740 = vmatmul.msk.bf16.gmra.mxu2 %vm326_vm1, %v1682_v22 }
 0x26e   : > { %2778 = vmatmul.msk.bf16.gmra.mxu0 %vm326_vm1, %v2178_v29  ;;  %2761 = vmatmul.msk.bf16.gmra.mxu3 %vm326_vm1, %v1932_v28 }
 0x26f   : > { %v2391_v47 = vadd.f32 %v3622_v21, %v2351_v56 }
 0x270   : > { %v1784_v30 = vpop.f32.mrf.mxu2 }
 0x271   : > { %v2427_v48 = vmax.f32 %v2391_v47, 0.0  ;;  %v1856_v60 = vadd.f32 %v1784_v30, %v1608_v34  ;;  %v1538_v54 = vpop.f32.mrf.mxu1  ;;  %v3760_v3 = vpop.f32.mrf.mxu3  ;;  %v1664_v47 = vld [vmem:[%s3027_s11 + $0x124] sm:$0xff]  ;;  %v1665_v34 = vld [vmem:[%s3027_s11 + $0x12c] sm:$0xff] }
 0x272   : > { %v1609_v10 = vadd.f32 %v1538_v54, %v3428_v9  ;;  %v2160_v30 = vld [vmem:[%s3027_s11 + $0x126] sm:$0xff]  ;;  %v1684_v35 = vpack.c.bf16 %v1665_v34, %v1664_v47 }
 0x273   : > { %v2282_v59 = vpop.f32.mrf.mxu0  ;;  %2463 = vst [vmem:[%s3636_s9 + $0x58] sm:$0xff] %v2427_v48  ;;  %v2104_v12 = vadd.f32 %v3716_v13, %v1856_v60  ;;  %v1914_v13 = vld [vmem:[%s3027_s11 + $0x135] sm:$0xff] }
 0x274   : > { %v1933_v15 = vpack.c.bf16 %v1915_v17, %v1914_v13  ;;  %v2161_v48 = vld [vmem:[%s3027_s11 + $0x12e] sm:$0xff] }
 0x275   : > { %v2352_v57 = vadd.f32 %v2280_v36, %v2104_v12  ;;  %v2180_v19 = vpack.c.bf16 %v2161_v48, %v2160_v30  ;;  %v1666_v17 = vld [vmem:[%s3027_s11 + $0x134] sm:$0xff] }
 0x277   : > { %v2392_v50 = vadd.f32 %v3622_v21, %v2352_v57 }
 0x278   : > { %v1786_v27 = vpop.f32.mrf.mxu2 }
 0x279   : > { %v2428_v45 = vmax.f32 %v2392_v50, 0.0  ;;  %v1857_v62 = vadd.f32 %v1786_v27, %v1609_v10  ;;  %v1541_v14 = vpop.f32.mrf.mxu1  ;;  %v3772_v52 = vpop.f32.mrf.mxu3 }
 0x27a   : > { %v1610_v29 = vadd.f32 %v1541_v14, %v3434_v49 }
 0x27b   : > { %v2285_v39 = vpop.f32.mrf.mxu0  ;;  %2464 = vst [vmem:[%s3636_s9 + $0x60] sm:$0xff] %v2428_v45  ;;  %v2105_v11 = vadd.f32 %v3728_v42, %v1857_v62 }
 0x27c   : > { %2722 = vmatmul.msk.bf16.gmra.mxu1 %vm326_vm1, %v1682_v22 }
 0x27d   : > { %v2353_v9 = vadd.f32 %v2282_v59, %v2105_v11  ;;  %2741 = vmatmul.msk.bf16.gmra.mxu2 %vm326_vm1, %v1683_v61  ;;  %v2162_v11 = vld [vmem:[%s3027_s11 + $0x136] sm:$0xff] }
 0x27e   : > { %2779 = vmatmul.msk.bf16.gmra.mxu0 %vm326_vm1, %v2179_v31  ;;  %2762 = vmatmul.msk.bf16.gmra.mxu3 %vm326_vm1, %v1933_v15  ;;  %v2163_v15 = vld [vmem:[%s3027_s11 + $0x13e] sm:$0xff] }
 0x27f   : > { %v2393_v32 = vadd.f32 %v3622_v21, %v2353_v9 }
 0x280   : > { %v1789_v58 = vpop.f32.mrf.mxu2 }
 0x281   : > { %v2429_v42 = vmax.f32 %v2393_v32, 0.0  ;;  %v1858_v0 = vadd.f32 %v1789_v58, %v1610_v29  ;;  %v1543_v22 = vpop.f32.mrf.mxu1  ;;  %v2047_v28 = vpop.f32.mrf.mxu3 }
 0x282   : > { %v1611_v49 = vadd.f32 %v1543_v22, %v3445_v26  ;;  %v2181_v22 = vpack.c.bf16 %v2163_v15, %v2162_v11 }
 0x283   : > { %v2287_v36 = vpop.f32.mrf.mxu0  ;;  %2465 = vst [vmem:[%s3636_s9 + $0x68] sm:$0xff] %v2429_v42  ;;  %v2106_v41 = vadd.f32 %v3738_v24, %v1858_v0 }
 0x285   : > { %v2354_v56 = vadd.f32 %v2285_v39, %v2106_v41  ;;  %v1667_v39 = vld [vmem:[%s3027_s11 + $0x13c] sm:$0xff] }
 0x286   : > { %v1685_v0 = vpack.c.bf16 %v1667_v39, %v1666_v17 }
 0x287   : > { %v2394_v60 = vadd.f32 %v3622_v21, %v2354_v56 }
 0x288   : > { %v1791_v54 = vpop.f32.mrf.mxu2 }
 0x289   : > { %v2430_v59 = vmax.f32 %v2394_v60, 0.0  ;;  %v1859_v12 = vadd.f32 %v1791_v54, %v1611_v49  ;;  %v1546_v57 = vpop.f32.mrf.mxu1  ;;  %v2049_v37 = vpop.f32.mrf.mxu3 }
 0x28a   : > { %v1612_v10 = vadd.f32 %v1546_v57, %v3451_v1 }
 0x28b   : > { %v2290_v44 = vpop.f32.mrf.mxu0  ;;  %2466 = vst [vmem:[%s3636_s9 + $0x70] sm:$0xff] %v2430_v59  ;;  %v2107_v24 = vadd.f32 %v3750_v2, %v1859_v12 }
 0x28c   : > { %2723 = vmatmul.msk.bf16.gmra.mxu1 %vm326_vm1, %v1683_v61 }
 0x28d   : > { %v2355_v50 = vadd.f32 %v2287_v36, %v2107_v24  ;;  %2742 = vmatmul.msk.bf16.gmra.mxu2 %vm326_vm1, %v1684_v35 }
 0x28e   : > { %2780 = vmatmul.msk.bf16.gmra.mxu0 %vm326_vm1, %v2180_v19 }
 0x28f   : > { %v2395_v26 = vadd.f32 %v3622_v21, %v2355_v50 }
 0x290   : > { %v1794_v27 = vpop.f32.mrf.mxu2 }
 0x291   : > { %v2431_v45 = vmax.f32 %v2395_v26, 0.0  ;;  %v1860_v62 = vadd.f32 %v1794_v27, %v1612_v10  ;;  %v1548_v2 = vpop.f32.mrf.mxu1  ;;  %v2052_v31 = vpop.f32.mrf.mxu3 }
 0x292   : > { %v1613_v32 = vadd.f32 %v1548_v2, %v3462_v43 }
 0x293   : > { %v2292_v14 = vpop.f32.mrf.mxu0  ;;  %2467 = vst [vmem:[%s3636_s9 + $0x78] sm:$0xff] %v2431_v45  ;;  %v2108_v61 = vadd.f32 %v3760_v3, %v1860_v62 }
 0x295   : > { %v2356_v13 = vadd.f32 %v2290_v44, %v2108_v61 }
 0x297   : > { %v2396_v9 = vadd.f32 %v3622_v21, %v2356_v13 }
 0x298   : > { %v1796_v1 = vpop.f32.mrf.mxu2 }
 0x299   : > { %v2432_v29 = vmax.f32 %v2396_v9, 0.0  ;;  %v1861_v58 = vadd.f32 %v1796_v1, %v1613_v32  ;;  %v1551_v42 = vpop.f32.mrf.mxu1  ;;  %v2054_v56 = vpop.f32.mrf.mxu3 }
 0x29a   : > { %v1614_v47 = vadd.f32 %v1551_v42, %v3469_v46 }
 0x29b   : > { %v2295_v36 = vpop.f32.mrf.mxu0  ;;  %2468 = vst [vmem:[%s3636_s9 + $0x80] sm:$0xff] %v2432_v29  ;;  %v2109_v3 = vadd.f32 %v3772_v52, %v1861_v58 }
 0x29c   : > { %2724 = vmatmul.msk.bf16.gmra.mxu1 %vm326_vm1, %v1684_v35 }
 0x29d   : > { %v2357_v41 = vadd.f32 %v2292_v14, %v2109_v3  ;;  %2743 = vmatmul.msk.bf16.gmra.mxu2 %vm326_vm1, %v1685_v0 }
 0x29e   : > { %2781 = vmatmul.msk.bf16.gmra.mxu0 %vm326_vm1, %v2181_v22 }
 0x29f   : > { %v2397_v43 = vadd.f32 %v3622_v21, %v2357_v41 }
 0x2a0   : > { %v1799_v34 = vpop.f32.mrf.mxu2 }
 0x2a1   : > { %v2433_v30 = vmax.f32 %v2397_v43, 0.0  ;;  %v1862_v48 = vadd.f32 %v1799_v34, %v1614_v47  ;;  %v1553_v60 = vpop.f32.mrf.mxu1  ;;  %v2057_v35 = vpop.f32.mrf.mxu3 }
 0x2a2   : > { %v1615_v12 = vadd.f32 %v1553_v60, %v3480_v4 }
 0x2a3   : > { %v2297_v49 = vpop.f32.mrf.mxu0  ;;  %2469 = vst [vmem:[%s3636_s9 + $0x88] sm:$0xff] %v2433_v30  ;;  %v2110_v52 = vadd.f32 %v2047_v28, %v1862_v48 }
 0x2a5   : > { %v2358_v54 = vadd.f32 %v2295_v36, %v2110_v52 }
 0x2a7   : > { %v2398_v59 = vadd.f32 %v3622_v21, %v2358_v54 }
 0x2a8   : > { %v1801_v57 = vpop.f32.mrf.mxu2 }
 0x2a9   : > { %v2434_v19 = vmax.f32 %v2398_v59, 0.0  ;;  %v1863_v44 = vadd.f32 %v1801_v57, %v1615_v12  ;;  %v1556_v24 = vpop.f32.mrf.mxu1  ;;  %v2059_v14 = vpop.f32.mrf.mxu3 }
 0x2aa   : > { %v1616_v27 = vadd.f32 %v1556_v24, %v3485_v5 }
 0x2ab   : > { %v2300_v46 = vpop.f32.mrf.mxu0  ;;  %2470 = vst [vmem:[%s3636_s9 + $0x90] sm:$0xff] %v2434_v19  ;;  %v2111_v50 = vadd.f32 %v2049_v37, %v1863_v44 }
 0x2ad   : > { %v2359_v26 = vadd.f32 %v2297_v49, %v2111_v50 }
 0x2af   : > { %v2399_v10 = vadd.f32 %v3622_v21, %v2359_v26 }
 0x2b0   : > { %v1804_v28 = vpop.f32.mrf.mxu2 }
 0x2b1   : > { %v2435_v45 = vmax.f32 %v2399_v10, 0.0  ;;  %v1864_v62 = vadd.f32 %v1804_v28, %v1616_v27  ;;  %v1558_v2 = vpop.f32.mrf.mxu1  ;;  %v2062_v1 = vpop.f32.mrf.mxu3 }
 0x2b2   : > { %v1617_v39 = vadd.f32 %v1558_v2, %v3496_v63 }
 0x2b3   : > { %v2302_v4 = vpop.f32.mrf.mxu0  ;;  %2471 = vst [vmem:[%s3636_s9 + $0x98] sm:$0xff] %v2435_v45  ;;  %v2112_v61 = vadd.f32 %v2052_v31, %v1864_v62 }
 0x2b5   : > { %v2360_v13 = vadd.f32 %v2300_v46, %v2112_v61 }
 0x2b7   : > { %v2400_v17 = vadd.f32 %v3622_v21, %v2360_v13 }
 0x2b8   : > { %v1806_v37 = vpop.f32.mrf.mxu2 }
 0x2b9   : > { %v2436_v11 = vmax.f32 %v2400_v17, 0.0  ;;  %v1865_v15 = vadd.f32 %v1806_v37, %v1617_v39  ;;  %v1561_v9 = vpop.f32.mrf.mxu1  ;;  %v2064_v43 = vpop.f32.mrf.mxu3 }
 0x2ba   : > { %v1618_v42 = vadd.f32 %v1561_v9, %v3501_v38 }
 0x2bb   : > { %v2305_v5 = vpop.f32.mrf.mxu0  ;;  %2472 = vst [vmem:[%s3636_s9 + $0xa0] sm:$0xff] %v2436_v11  ;;  %v2113_v32 = vadd.f32 %v2054_v56, %v1865_v15 }
 0x2bd   : > { %v2361_v29 = vadd.f32 %v2302_v4, %v2113_v32 }
 0x2bf   : > { %v2401_v58 = vadd.f32 %v3622_v21, %v2361_v29 }
 0x2c0   : > { %v1809_v31 = vpop.f32.mrf.mxu2 }
 0x2c1   : > { %v2437_v0 = vmax.f32 %v2401_v58, 0.0  ;;  %v1866_v22 = vadd.f32 %v1809_v31, %v1618_v42  ;;  %v1563_v36 = vpop.f32.mrf.mxu1  ;;  %v2067_v57 = vpop.f32.mrf.mxu3 }
 0x2c2   : > { %v1619_v56 = vadd.f32 %v1563_v36, %v3512_v16 }
 0x2c3   : > { %v2307_v63 = vpop.f32.mrf.mxu0  ;;  %2473 = vst [vmem:[%s3636_s9 + $0xa8] sm:$0xff] %v2437_v0  ;;  %v2114_v3 = vadd.f32 %v2057_v35, %v1866_v22 }
 0x2c5   : > { %v2362_v41 = vadd.f32 %v2305_v5, %v2114_v3 }
 0x2c7   : > { %v2402_v47 = vadd.f32 %v3622_v21, %v2362_v41 }
 0x2c8   : > { %v1811_v34 = vpop.f32.mrf.mxu2 }
 0x2c9   : > { %v2438_v30 = vmax.f32 %v2402_v47, 0.0  ;;  %v1867_v48 = vadd.f32 %v1811_v34, %v1619_v56  ;;  %v1566_v60 = vpop.f32.mrf.mxu1  ;;  %v2069_v62 = vpop.f32.mrf.mxu3 }
 0x2ca   : > { %v1620_v59 = vadd.f32 %v1566_v60, %v3517_v53 }
 0x2cb   : > { %v2310_v38 = vpop.f32.mrf.mxu0  ;;  %2474 = vst [vmem:[%s3636_s9 + $0xb0] sm:$0xff] %v2438_v30  ;;  %v2115_v49 = vadd.f32 %v2059_v14, %v1867_v48 }
 0x2cd   : > { %v2363_v52 = vadd.f32 %v2307_v63, %v2115_v49 }
 0x2cf   : > { %v2403_v54 = vadd.f32 %v3622_v21, %v2363_v52 }
 0x2d0   : > { %v1814_v12 = vpop.f32.mrf.mxu2 }
 0x2d1   : > { %v2439_v35 = vmax.f32 %v2403_v54, 0.0  ;;  %v1868_v19 = vadd.f32 %v1814_v12, %v1620_v59  ;;  %v1568_v44 = vpop.f32.mrf.mxu1  ;;  %v2072_v15 = vpop.f32.mrf.mxu3 }
 0x2d2   : > { %v1621_v26 = vadd.f32 %v1568_v44, %v3528_v33 }
 0x2d3   : > { %v2312_v16 = vpop.f32.mrf.mxu0  ;;  %2475 = vst [vmem:[%s3636_s9 + $0xb8] sm:$0xff] %v2439_v35  ;;  %v2116_v24 = vadd.f32 %v2062_v1, %v1868_v19 }
 0x2d5   : > { %v2364_v46 = vadd.f32 %v2310_v38, %v2116_v24 }
 0x2d7   : > { %v2404_v50 = vadd.f32 %v3622_v21, %v2364_v46 }
 0x2d8   : > { %v1816_v10 = vpop.f32.mrf.mxu2 }
 0x2d9   : > { %v2440_v27 = vmax.f32 %v2404_v50, 0.0  ;;  %v1869_v28 = vadd.f32 %v1816_v10, %v1621_v26  ;;  %v1571_v45 = vpop.f32.mrf.mxu1  ;;  %v2074_v22 = vpop.f32.mrf.mxu3 }
 0x2da   : > { %v1622_v61 = vadd.f32 %v1571_v45, %v3533_v7 }
 0x2db   : > { %v2315_v53 = vpop.f32.mrf.mxu0  ;;  %2476 = vst [vmem:[%s3636_s9 + $0xc0] sm:$0xff] %v2440_v27  ;;  %v2117_v2 = vadd.f32 %v2064_v43, %v1869_v28 }
 0x2dd   : > { %v2365_v4 = vadd.f32 %v2312_v16, %v2117_v2 }
 0x2df   : > { %v2405_v14 = vadd.f32 %v3622_v21, %v2365_v4 }
 0x2e0   : > { %v1819_v13 = vpop.f32.mrf.mxu2 }
 0x2e1   : > { %v2441_v17 = vmax.f32 %v2405_v14, 0.0  ;;  %v1870_v39 = vadd.f32 %v1819_v13, %v1622_v61  ;;  %v1573_v37 = vpop.f32.mrf.mxu1  ;;  %v2077_v38 = vpop.f32.mrf.mxu3 }
 0x2e2   : > { %v1623_v32 = vadd.f32 %v1573_v37, %v3544_v51 }
 0x2e3   : > { %v2317_v33 = vpop.f32.mrf.mxu0  ;;  %2477 = vst [vmem:[%s3636_s9 + $0xc8] sm:$0xff] %v2441_v17  ;;  %v2118_v11 = vadd.f32 %v2067_v57, %v1870_v39 }
 0x2e5   : > { %v2366_v9 = vadd.f32 %v2315_v53, %v2118_v11 }
 0x2e7   : > { %v2406_v5 = vadd.f32 %v3622_v21, %v2366_v9 }
 0x2e8   : > { %v1821_v1 = vpop.f32.mrf.mxu2 }
 0x2e9   : > { %v2442_v29 = vmax.f32 %v2406_v5, 0.0  ;;  %v1871_v58 = vadd.f32 %v1821_v1, %v1623_v32  ;;  %v1576_v42 = vpop.f32.mrf.mxu1 }
 0x2ea   : > { %v1624_v63 = vadd.f32 %v1576_v42, %v3549_v18 }
 0x2eb   : > { %v2320_v7 = vpop.f32.mrf.mxu0  ;;  %2478 = vst [vmem:[%s3636_s9 + $0xd0] sm:$0xff] %v2442_v29  ;;  %v2119_v31 = vadd.f32 %v2069_v62, %v1871_v58 }
 0x2ed   : > { %v2367_v0 = vadd.f32 %v2317_v33, %v2119_v31 }
 0x2ef   : > { %v2407_v36 = vadd.f32 %v3622_v21, %v2367_v0 }
 0x2f0   : > { %v1824_v3 = vpop.f32.mrf.mxu2 }
 0x2f1   : > { %v2443_v41 = vmax.f32 %v2407_v36, 0.0  ;;  %v1872_v43 = vadd.f32 %v1824_v3, %v1624_v63  ;;  %v1578_v47 = vpop.f32.mrf.mxu1 }
 0x2f2   : > { %v1625_v48 = vadd.f32 %v1578_v47, %v3560_v20  ;;  %v2079_v20 = vpop.f32.mrf.mxu3 }
 0x2f3   : > { %v2322_v51 = vpop.f32.mrf.mxu0  ;;  %2479 = vst [vmem:[%s3636_s9 + $0xd8] sm:$0xff] %v2443_v41  ;;  %v2120_v56 = vadd.f32 %v2072_v15, %v1872_v43 }
 0x2f5   : > { %v2368_v34 = vadd.f32 %v2320_v7, %v2120_v56 }
 0x2f7   : > { %v2408_v30 = vadd.f32 %v3622_v21, %v2368_v34 }
 0x2f8   : > { %v1826_v60 = vpop.f32.mrf.mxu2 }
 0x2f9   : > { %v2444_v49 = vmax.f32 %v2408_v30, 0.0  ;;  %v1873_v52 = vadd.f32 %v1826_v60, %v1625_v48  ;;  %v1581_v54 = vpop.f32.mrf.mxu1 }
 0x2fa   : > { %v1626_v35 = vadd.f32 %v1581_v54, %v3565_v55  ;;  %v2082_v2 = vpop.f32.mrf.mxu3 }
 0x2fb   : > { %v2325_v18 = vpop.f32.mrf.mxu0  ;;  %2480 = vst [vmem:[%s3636_s9 + $0xe0] sm:$0xff] %v2444_v49  ;;  %v2121_v59 = vadd.f32 %v2074_v22, %v1873_v52 }
 0x2fd   : > { %v2369_v12 = vadd.f32 %v2322_v51, %v2121_v59 }
 0x2ff   : > { %v2409_v57 = vadd.f32 %v3622_v21, %v2369_v12 }
 0x300   : > { %v1829_v19 = vpop.f32.mrf.mxu2 }
 0x301   : > { %v2445_v44 = vmax.f32 %v2409_v57, 0.0  ;;  %v1874_v16 = vadd.f32 %v1829_v19, %v1626_v35  ;;  %v1583_v24 = vpop.f32.mrf.mxu1 }
 0x302   : > { %v1627_v27 = vadd.f32 %v1583_v24, %v3576_v6  ;;  %v2084_v15 = vpop.f32.mrf.mxu3 }
 0x303   : > { %2481 = vst [vmem:[%s3636_s9 + $0xe8] sm:$0xff] %v2445_v44  ;;  %v2122_v46 = vadd.f32 %v2077_v38, %v1874_v16  ;;  %v2327_v50 = vpop.f32.mrf.mxu0 }
 0x305   : > { %v2370_v26 = vadd.f32 %v2325_v18, %v2122_v46 }
 0x307   : > { %v2410_v10 = vadd.f32 %v3622_v21, %v2370_v26 }
 0x308   : > { %v1831_v28 = vpop.f32.mrf.mxu2 }
 0x309   : > { %v2446_v45 = vmax.f32 %v2410_v10, 0.0  ;;  %v1875_v53 = vadd.f32 %v1831_v28, %v1627_v27  ;;  %v1586_v62 = vpop.f32.mrf.mxu1 }
 0x30a   : > { %v1628_v13 = vadd.f32 %v1586_v62, %v3581_v8  ;;  %v2087_v22 = vpop.f32.mrf.mxu3 }
 0x30b   : > { %2482 = vst [vmem:[%s3636_s9 + $0xf0] sm:$0xff] %v2446_v45  ;;  %v2123_v55 = vadd.f32 %v2079_v20, %v1875_v53  ;;  %v2330_v14 = vpop.f32.mrf.mxu0 }
 0x30d   : > { %v2371_v4 = vadd.f32 %v2327_v50, %v2123_v55 }
 0x30f   : > { %v2411_v61 = vadd.f32 %v3622_v21, %v2371_v4 }
 0x310   : > { %v1834_v17 = vpop.f32.mrf.mxu2 }
 0x311   : > { %v2447_v39 = vmax.f32 %v2411_v61, 0.0  ;;  %v1876_v37 = vadd.f32 %v1834_v17, %v1628_v13  ;;  %v1588_v33 = vpop.f32.mrf.mxu1 }
 0x312   : > { %v1629_v5 = vadd.f32 %v1588_v33, %v3594_v23  ;;  %v2089_v48 = vpop.f32.mrf.mxu3 }
 0x313   : > { %2483 = vst [vmem:[%s3636_s9 + $0xf8] sm:$0xff] %v2447_v39  ;;  %v2124_v6 = vadd.f32 %v2082_v2, %v1876_v37  ;;  %v2332_v32 = vpop.f32.mrf.mxu0 }
 0x315   : > { %v2372_v11 = vadd.f32 %v2330_v14, %v2124_v6 }
 0x317   : > { %v2412_v9 = vadd.f32 %v3622_v21, %v2372_v11 }
 0x318   : > { %v1836_v1 = vpop.f32.mrf.mxu2 }
 0x319   : > { %v2448_v29 = vmax.f32 %v2412_v9, 0.0  ;;  %v1877_v58 = vadd.f32 %v1836_v1, %v1629_v5  ;;  %v1591_v8 = vpop.f32.mrf.mxu1 }
 0x31a   : > { %v1630_v0 = vadd.f32 %v1591_v8, %v3601_v25 }
 0x31b   : > { %2484 = vst [vmem:[%s3636_s9 + $0x100] sm:$0xff] %v2448_v29  ;;  %v2125_v42 = vadd.f32 %v2084_v15, %v1877_v58  ;;  %v2335_v23 = vpop.f32.mrf.mxu0 }
 0x31d   : > { %v2373_v7 = vadd.f32 %v2332_v32, %v2125_v42 }
 0x31f   : > { %v2413_v31 = vadd.f32 %v3622_v21, %v2373_v7 }
 0x320   : > { %v1839_v36 = vpop.f32.mrf.mxu2 }
 0x321   : > { %v2449_v63 = vmax.f32 %v2413_v31, 0.0  ;;  %v1878_v3 = vadd.f32 %v1839_v36, %v1630_v0  ;;  %v1593_v43 = vpop.f32.mrf.mxu1 }
 0x322   : > { %v1631_v56 = vadd.f32 %v1593_v43, %v3614_v40 }
 0x323   : > { %2485 = vst [vmem:[%s3636_s9 + $0x108] sm:$0xff] %v2449_v63  ;;  %v2126_v41 = vadd.f32 %v2087_v22, %v1878_v3  ;;  %v2337_v38 = vpop.f32.mrf.mxu0 }
 0x325   : > { %v2374_v47 = vadd.f32 %v2335_v23, %v2126_v41 }
 0x327   : > { %v2414_v51 = vadd.f32 %v3622_v21, %v2374_v47 }
 0x328   : > { %v1841_v34 = vpop.f32.mrf.mxu2 }
 0x329   : > { %v2450_v25 = vmax.f32 %v2414_v51, 0.0  ;;  %v1879_v30 = vadd.f32 %v1841_v34, %v1631_v56 }
 0x32b   : > { %2486 = vst [vmem:[%s3636_s9 + $0x110] sm:$0xff] %v2450_v25  ;;  %v2127_v60 = vadd.f32 %v2089_v48, %v1879_v30 }
 0x32d   : > { %v2375_v49 = vadd.f32 %v2337_v38, %v2127_v60 }
 0x32f   : > { %v2415_v52 = vadd.f32 %v3622_v21, %v2375_v49 }
 0x331   : > { %v2451_v40 = vmax.f32 %v2415_v52, 0.0 }
 0x333   : > { %2487 = vst [vmem:[%s3636_s9 + $0x118] sm:$0xff] %v2451_v40 }
 0x334   : > { %2876 = shalt.err (!%p2873_p5)
}
 0x335   : > { %s2929_s5 = smov 128   ;;  %s2930_s7 = smov 8  }
 0x336   : > { %2791 = dma.vmem_to_hbm [thread:$0]  (%p2991_p4), %s2503_s15, 4608, %s2505_s21, %s2489_s23, %s2929_s5, %s2929_s5, %s2930_s7  }
 0x337 PF: > { %p2797_p6 = scmp.ge.s32.totalorder %s2927_s17, 2  ;;  %s2519_s8 = sand.u32 1, %s2907_s12  }
 0x338   : > { %s2520_s9 = scalar_lea.sflag [#allocation3], %s2519_s8 }
 0x339   : > { %p2794_p7 = pnand %p2797_p6, %p2998_p8 }
 0x33b   : > { %p2795_p9 = pneg %p2794_p7 }
 0x33d   : > { %2902 = dma.done.wait (%p2795_p9), %s2520_s9, 4608  }
 0x33e   : > { %2904 = vsyncadd (%p2795_p9), %s2520_s9, 4294962688  ;;  %s16_s17 = sadd.s32 1, %s2927_s17   ;;  %s3909_s12 = smov %s2911_s13 }
 0x33f   : > { %p13_p10 = scmp.ge.s32.totalorder %s16_s17, 4   ;;  %s3910_s13 = smov %s2915_s14 }
 0x340   : > { %s3911_s14 = smov %s3004_s25  ;;  %s3912_s15 = smov %s2923_s16 }
 0x341   : > { %s3913_s16 = smov %s3915_s20  ;;  %15 = sbr.rel (!%p13_p10) target bundleno = 4 (0x4), region = 81 }
 0x346   :  { %2526 = vsyncpa [#allocation3], 1 }
 0x347   :  { %2528 = vsyncpa [#allocation3 + $0x1], 1 }

</bundles_post_ra>
